<compile_context>
chip_gen: v7x
topology: tpu7x:2x2x1
jax: 0.10.0
libtpu: 0.0.40
codegen_flags: <defaults>
</compile_context>

<pallas_src>
import math
import functools

import numpy as np
import jax
import jax.numpy as jnp
from jax.experimental import pallas as pl
from jax.experimental.pallas import tpu as pltpu


def _pos_embed_sine_kernel(mult_ref, phase_ref, o_ref, *, num_pos_feats, width,
                           coord_offset, tile_hw):
    """o_ref: (C, tile_hw) f32 tile of the (C, H*W) output.

    mult_ref / phase_ref: (C, 1) f32 per-channel constants
      mult[c]  = (normalize scale) / dim_t[c mod F]
      phase[c] = pi/2 for odd channels (cos), 0 for even channels (sin)
    """
    F = num_pos_feats
    W = width
    shape = o_ref.shape                                   # (C, tile_hw)

    l0 = pl.program_id(0) * tile_hw
    l = jax.lax.broadcasted_iota(jnp.int32, shape, 1) + l0   # flattened index h*W + w
    c = jax.lax.broadcasted_iota(jnp.int32, shape, 0)        # channel index

    if (W & (W - 1)) == 0:
        # Power-of-two width: exact bit ops (always lowerable on the VPU).
        shift = int(W).bit_length() - 1
        h = jnp.right_shift(l, shift)
        w = jnp.bitwise_and(l, W - 1)
    else:
        # Correctly-rounded f32 divide with a +0.5 guard: exact for spat_dim <~ 2800.
        h = jnp.floor((l.astype(jnp.float32) + 0.5) / jnp.float32(W)).astype(jnp.int32)
        w = l - h * W

    # y-half of the channels (c < F) depends on the row index, x-half on the column.
    coord = jnp.where(c < F, h, w).astype(jnp.float32) + jnp.float32(coord_offset)

    # One transcendental per element: sin covers both sin (even ch) and cos (odd ch,
    # phase = pi/2).  mult/phase broadcast from (C, 1) along the lane axis.
    o_ref[...] = jnp.sin(coord * mult_ref[...] + phase_ref[...])


def _choose_tile_hw(hw, channels, max_block_bytes=4 << 20):
    """Largest multiple-of-128 divisor of hw that keeps blocks <= ~4 MiB and, when
    possible, yields a grid of >= 2 steps (so v7x's two TensorCores both get work)."""
    if hw % 128 != 0:
        return hw                                   # tiny/odd sizes: single full block
    cap = max(128, (max_block_bytes // (channels * 4)) // 128 * 128)
    best = None
    for t in range(128, min(hw, cap) + 1, 128):
        if hw % t == 0 and hw // t >= 2:
            best = t
    return best if best is not None else min(hw, cap)   # hw == 128 case


def position_embedding_sine(spat_dim, num_pos_feats=64, temperature=10000,
                            normalize=False):
    """Returns pos of shape (1, 2*num_pos_feats, spat_dim, spat_dim), float32."""
    F = int(num_pos_feats)
    C = 2 * F
    H = W = int(spat_dim)
    HW = H * W
    scale = 2.0 * math.pi

    # ---- trace-time per-channel constants (no in-kernel exp / div) -------------
    k = np.arange(F, dtype=np.float64)
    inv_dim_t = 1.0 / (float(temperature) ** (2.0 * np.floor(k / 2.0) / F))
    phase = np.where((np.arange(F) % 2) == 1, np.pi / 2.0, 0.0)
    if normalize:
        coord_offset = 0.5                            # embed = (idx + 1) - 0.5
        norm = scale / (float(spat_dim) + 1e-6)       # / (last cumsum + eps) * scale
    else:
        coord_offset = 1.0                            # embed = idx + 1 (cumsum of ones)
        norm = 1.0
    mult_c = np.tile(inv_dim_t * norm, 2).astype(np.float32).reshape(C, 1)
    phase_c = np.tile(phase, 2).astype(np.float32).reshape(C, 1)

    tile_hw = _choose_tile_hw(HW, C)
    grid = (HW // tile_hw,)

    kernel = functools.partial(
        _pos_embed_sine_kernel,
        num_pos_feats=F, width=W, coord_offset=coord_offset, tile_hw=tile_hw)

    pos_c_hw = pl.pallas_call(
        kernel,
        out_shape=jax.ShapeDtypeStruct((C, HW), jnp.float32),
        grid=grid,
        in_specs=[pl.BlockSpec((C, 1), lambda i: (0, 0)),
                  pl.BlockSpec((C, 1), lambda i: (0, 0))],
        out_specs=pl.BlockSpec((C, tile_hw), lambda i: (0, i)),
        compiler_params=pltpu.CompilerParams(
            dimension_semantics=("parallel",)),
    )(jnp.asarray(mult_c), jnp.asarray(phase_c))

    # (C, H*W) -> (1, C, H, W): pure metadata reshape (matches torch's permute(0,3,1,2)).
    return pos_c_hw.reshape(1, C, H, W)


def _reference_jax(spat_dim, num_pos_feats=64, temperature=10000, normalize=False):
    """Plain-JAX re-implementation of the PyTorch forward, for verification."""
    scale = 2.0 * math.pi
    not_mask = jnp.ones((1, spat_dim, spat_dim), jnp.float32)
    y_embed = jnp.cumsum(not_mask, axis=1)
    x_embed = jnp.cumsum(not_mask, axis=2)
    if normalize:
        eps = 1e-6
        y_embed = (y_embed - 0.5) / (y_embed[:, -1:, :] + eps) * scale
        x_embed = (x_embed - 0.5) / (x_embed[:, :, -1:] + eps) * scale
    dim_t = jnp.arange(num_pos_feats, dtype=jnp.float32)
    dim_t = temperature ** (2 * (dim_t // 2) / num_pos_feats)
    pos_x = x_embed[:, :, :, None] / dim_t
    pos_y = y_embed[:, :, :, None] / dim_t
    pos_x = jnp.stack((jnp.sin(pos_x[:, :, :, 0::2]),
                       jnp.cos(pos_x[:, :, :, 1::2])), axis=4).reshape(
                           1, spat_dim, spat_dim, num_pos_feats)
    pos_y = jnp.stack((jnp.sin(pos_y[:, :, :, 0::2]),
                       jnp.cos(pos_y[:, :, :, 1::2])), axis=4).reshape(
                           1, spat_dim, spat_dim, num_pos_feats)
    pos = jnp.concatenate((pos_y, pos_x), axis=3)
    return jnp.transpose(pos, (0, 3, 1, 2))


if __name__ == "__main__":
    # The PyTorch forward takes only `spat_dim` (no tensor inputs, no parameters).
    key = jax.random.PRNGKey(0)  # deterministic setup (unused: module has no weights)
    spat_dim = 16
    num_pos_feats = 64

    for normalize in (False, True):
        pos = position_embedding_sine(spat_dim, num_pos_feats=num_pos_feats,
                                      temperature=10000, normalize=normalize)
        pos = jax.block_until_ready(pos)

        assert pos.shape == (1, 2 * num_pos_feats, spat_dim, spat_dim), pos.shape
        assert pos.dtype == jnp.float32

        ref = jax.block_until_ready(
            _reference_jax(spat_dim, num_pos_feats, 10000, normalize))
        err = float(jnp.max(jnp.abs(pos - ref)))
        assert jnp.allclose(pos, ref, rtol=1e-4, atol=1e-4), (normalize, err)

    print("KERNEL_OK")
</pallas_src>

<mosaic_0001>
module attributes {stable_mosaic.version = 11 : i64} {
  func.func @_pos_embed_sine_kernel(%arg0: i32, %arg1: memref<128x1xf32, #tpu.memory_space<vmem>>, %arg2: memref<128x1xf32, #tpu.memory_space<vmem>>, %arg3: memref<128x128xf32, #tpu.memory_space<vmem>>) attributes {dimension_semantics = [#tpu.dimension_semantics<parallel>], iteration_bounds = array<i64: 2>, scalar_prefetch = 0 : i64, scratch_operands = 0 : i64, tpu.core_type = #tpu.core_type<tc>, window_params = [{pipeline_mode = #tpu.pipeline_mode<synchronous>, transform_indices = @transform_0, window_bounds = array<i64: 128, 1>}, {pipeline_mode = #tpu.pipeline_mode<synchronous>, transform_indices = @transform_1, window_bounds = array<i64: 128, 1>}, {transform_indices = @transform_2, window_bounds = array<i64: 128, 128>}]} {
    %c128_i32 = arith.constant 128 : i32
    %0 = arith.muli %arg0, %c128_i32 : i32
    %1 = tpu.iota {dimensions = array<i32: 1>} : vector<128x128xi32>
    %2 = vector.broadcast %0 : i32 to vector<128x128xi32>
    %3 = arith.addi %1, %2 : vector<128x128xi32>
    %4 = tpu.iota {dimensions = array<i32: 0>} : vector<128x128xi32>
    %c4_i32 = arith.constant 4 : i32
    %5 = vector.broadcast %c4_i32 : i32 to vector<128x128xi32>
    %6 = arith.shrsi %3, %5 : vector<128x128xi32>
    %c15_i32 = arith.constant 15 : i32
    %7 = vector.broadcast %c15_i32 : i32 to vector<128x128xi32>
    %8 = arith.andi %3, %7 : vector<128x128xi32>
    %c64_i32 = arith.constant 64 : i32
    %9 = vector.broadcast %c64_i32 : i32 to vector<128x128xi32>
    %10 = arith.cmpi slt, %4, %9 : vector<128x128xi32>
    %11 = arith.select %10, %6, %8 : vector<128x128xi1>, vector<128x128xi32>
    %12 = arith.sitofp %11 : vector<128x128xi32> to vector<128x128xf32>
    %cst = arith.constant 1.000000e+00 : f32
    %13 = vector.broadcast %cst : f32 to vector<128x128xf32>
    %14 = arith.addf %12, %13 : vector<128x128xf32>
    %c0 = arith.constant 0 : index
    %c0_0 = arith.constant 0 : index
    %15 = vector.load %arg1[%c0, %c0_0] : memref<128x1xf32, #tpu.memory_space<vmem>>, vector<128x1xf32>
    %16 = vector.broadcast %15 : vector<128x1xf32> to vector<128x128xf32>
    %17 = arith.mulf %14, %16 : vector<128x128xf32>
    %c0_1 = arith.constant 0 : index
    %c0_2 = arith.constant 0 : index
    %18 = vector.load %arg2[%c0_1, %c0_2] : memref<128x1xf32, #tpu.memory_space<vmem>>, vector<128x1xf32>
    %19 = vector.broadcast %18 : vector<128x1xf32> to vector<128x128xf32>
    %20 = arith.addf %17, %19 : vector<128x128xf32>
    %21 = math.sin %20 : vector<128x128xf32>
    %c0_3 = arith.constant 0 : index
    %c0_4 = arith.constant 0 : index
    %22 = vector.load %arg3[%c0_3, %c0_4] : memref<128x128xf32, #tpu.memory_space<vmem>>, vector<128x128xf32>
    tpu.vector_store %arg3[%c0_3, %c0_4], %21 {strides = array<i32>} : memref<128x128xf32, #tpu.memory_space<vmem>>, vector<128x128xf32>,
    return
  }
  func.func @transform_0(%arg0: i32) -> (i32, i32) {
    %c0_i32 = arith.constant 0 : i32
    %c0_i32_0 = arith.constant 0 : i32
    %c0_i32_1 = arith.constant 0 : i32
    return %c0_i32, %c0_i32_0 : i32, i32
  }
  func.func @transform_1(%arg0: i32) -> (i32, i32) {
    %c0_i32 = arith.constant 0 : i32
    %c0_i32_0 = arith.constant 0 : i32
    %c0_i32_1 = arith.constant 0 : i32
    return %c0_i32, %c0_i32_0 : i32, i32
  }
  func.func @transform_2(%arg0: i32) -> (i32, i32) {
    %c0_i32 = arith.constant 0 : i32
    %c0_i32_0 = arith.constant 0 : i32
    return %c0_i32, %arg0 : i32, i32
  }
}

</mosaic_0001>

<bundles_post_ra>
// kernel: tpu_custom_call.1
= control target key start
LH: loop header
LB: loop body
LE: loop exit
PB: predicated region body
PF: predicated region fallthrough
CT: control target
= control target key end

     0   :  { %7 = vsyncpa [#allocation3], 0  ;;  %s3995_s0 = inlined_call_operand.vmem [shape: f32[128,1], index: 0, kind: input, shape index: {}]   ;;  %s3996_s1 = inlined_call_operand.vmem [shape: f32[128,1], index: 1, kind: input, shape index: {}]   ;;  %s3997_s2 = inlined_call_operand.hbm [shape: f32[128,256], index: 2, kind: output, shape index: {}]  }
   0x1   :  { %9 = vsyncpa [#allocation3 + $0x1], 0  ;;  %s2519_s9 = smov 0   ;;  %s2521_s10 = smov 0  }
   0x2   :  { %s2523_s11 = smov 0   ;;  %s2525_s12 = smov 0  }
   0x3 LB: > { %s2176_s13 = sadd.s32 4294967295, %s2491_s12   ;;  %s2177_s14 = sadd.s32 4294967294, %s2491_s12   ;;  %s2491_s12 = sphi %s2525_s12, %s4031_s12   ;;  %s2487_s11 = sphi %s2523_s11, %s4030_s11   ;;  %s2483_s10 = sphi %s2521_s10, %s4029_s10   ;;  %s2479_s9 = sphi %s2519_s9, %s4028_s9  }
   0x4   : > { %s2542_s15 = sadd.s32 1, %s2491_s12   ;;  %s64_s16 = sadd.s32 1, %s2487_s11 }
   0x5   : > { %s61_s17 = ssub.s32 %s2491_s12, %s2542_s15  ;;  %p74_p0 = scmp.ne.s32.totalorder %s2487_s11, %s2483_s10 }
   0x6   : > { %p62_p1 = scmp.eq.s32.totalorder %s61_s17, 0  ;;  %p75_p2 = scmp.eq.s32.totalorder %s2176_s13, 1 }
   0x7   : > { %p80_p3 = scmp.ne.s32.totalorder %s2483_s10, %s2479_s9  ;;  %p81_p4 = scmp.eq.s32.totalorder %s2177_s14, 1 }
   0x8   : > { %s2554_s18 = scalar_select %p62_p1, %s2487_s11, %s64_s16  }
   0x9   : > { %p2556_p5 = por %p75_p2, %p74_p0  ;;  %p2560_p6 = por %p81_p4, %p80_p3 }
   0xa   : > { %p2179_p7 = scmp.ge.s32.totalorder %s2491_s12, 1  ;;  %p105_p8 = scmp.lt.s32.totalorder %s2491_s12, 3 }
   0xc   : > { %p106_p9 = pnand %p2179_p7, %p105_p8 }
   0xd   : > { %v212_v0 = vld [vmem:[%s3995_s0 + $0x10] sm:$0xff] (!%p106_p9)  ;;  %v210_v1 = vld [vmem:[%s3995_s0] sm:$0xff] (!%p106_p9)  ;;  %v2493_v2 = vmov (!%p106_p9), 0   ;;  %v213_v3 = vld [vmem:[%s3995_s0 + $0x18] sm:$0xff] (!%p106_p9)  ;;  %v123_v33 = vlaneseq (!%p106_p9)  ;;  %s2664_s28 = sshll.u32 (!%p106_p9), %s2176_s13, 7  ;;  %s119_s13 = sand.u32 (!%p106_p9), 1, %s2483_s10  }
   0xe   : > { %109 = sbr.rel (%p106_p9) target bundleno = 624 (0x270), region = 28  ;;  %2364 = vset.pattern.permute.xlu1 (!%p106_p9), %v2493_v2  ;;  %2363 = vset.pattern.permute.xlu0 (!%p106_p9), %v2493_v2  ;;  %v211_v4 = vld [vmem:[%s3995_s0 + $0x8] sm:$0xff] (!%p106_p9)  ;;  %v214_v6 = vld [vmem:[%s3995_s0 + $0x20] sm:$0xff] (!%p106_p9)  ;;  %v217_v7 = vld [vmem:[%s3995_s0 + $0x38] sm:$0xff] (!%p106_p9)  ;;  %v125_v35 = vstv (!%p106_p9), %s2664_s28  ;;  %s2180_s29 = sshll.u32 (!%p106_p9), %s119_s13, 7 }
   0xf   : > { %238 = vperm.xlu1 (!%p106_p9), %2364, %v212_v0   ;;  %228 = vperm.xlu0 (!%p106_p9), %2363, %v210_v1   ;;  %v215_v5 = vld [vmem:[%s3995_s0 + $0x28] sm:$0xff] (!%p106_p9)  ;;  %v216_v8 = vld [vmem:[%s3995_s0 + $0x30] sm:$0xff] (!%p106_p9)  ;;  %v218_v10 = vld [vmem:[%s3995_s0 + $0x40] sm:$0xff] (!%p106_p9)  ;;  %v124_v34 = vand.u32 (!%p106_p9), 127, %v123_v33  ;;  %s2979_s30 = scalar_lea.vmem (!%p106_p9), [#allocation2], %s2180_s29  ;;  %s3946_s6 = scalar_lea.hbm (!%p106_p9), %s3997_s2, %s2664_s28 }
  0x10   : > { %v219_v9 = vld [vmem:[%s3995_s0 + $0x48] sm:$0xff] (!%p106_p9)  ;;  %v221_v11 = vld [vmem:[%s3995_s0 + $0x58] sm:$0xff] (!%p106_p9)  ;;  %v220_v12 = vld [vmem:[%s3995_s0 + $0x50] sm:$0xff] (!%p106_p9)  ;;  %s2127_s3 = sshll.u32 (!%p106_p9), %s2979_s30, 4  ;;  %s3954_s7 = scalar_lea.sflag (!%p106_p9), [#allocation3], %s119_s13  ;;  %s3948_s3 = int_to_ptr.vmem [resolvable:$true] %s2127_s3 }
  0x11   : > { %v223_v13 = vld [vmem:[%s3995_s0 + $0x68] sm:$0xff] (!%p106_p9)  ;;  %v222_v14 = vld [vmem:[%s3995_s0 + $0x60] sm:$0xff] (!%p106_p9)  ;;  %v225_v15 = vld [vmem:[%s3995_s0 + $0x78] sm:$0xff] (!%p106_p9)  ;;  %v126_v36 = vadd.s32 (!%p106_p9), %v125_v35, %v124_v34  ;;  %s2429_s8 = scalar_lea.vmem (!%p106_p9), %s3948_s3, 2048  ;;  %s2500_s14 = smov (!%p106_p9), [#allocation2]  }
  0x12   : > { %v224_v16 = vld [vmem:[%s3995_s0 + $0x70] sm:$0xff] (!%p106_p9)  ;;  %v323_v17 = vld [vmem:[%s3996_s1 + $0x8] sm:$0xff] (!%p106_p9)  ;;  %v322_v18 = vld [vmem:[%s3996_s1] sm:$0xff] (!%p106_p9)  ;;  %p2430_p10 = scmp.ne.s32.totalorder (!%p106_p9), %s3948_s3, %s2429_s8  ;;  %s2433_s16 = sshll.u32 (!%p106_p9), %s2500_s14, 4  ;;  %s2434_s16 = int_to_ptr.vmem [resolvable:$false] %s2433_s16 }
  0x13   : > { %243 = vperm.xlu1 (!%p106_p9), %2364, %v213_v3   ;;  %233 = vperm.xlu0 (!%p106_p9), %2363, %v211_v4   ;;  %v325_v19 = vld [vmem:[%s3996_s1 + $0x18] sm:$0xff] (!%p106_p9)  ;;  %v324_v20 = vld [vmem:[%s3996_s1 + $0x10] sm:$0xff] (!%p106_p9)  ;;  %v327_v21 = vld [vmem:[%s3996_s1 + $0x28] sm:$0xff] (!%p106_p9)  ;;  %v144_v37 = vshra.s32 (!%p106_p9), %v126_v36, 4  ;;  %v145_v43 = vand.u32 (!%p106_p9), 15, %v126_v36  ;;  %s2435_s17 = scalar_lea.vmem (!%p106_p9), %s2434_s16, 4096  ;;  %p2436_p13 = scmp.lt.s32.totalorder (!%p106_p9), %s3948_s3, %s2434_s16 }
  0x14   : > { %v326_v22 = vld [vmem:[%s3996_s1 + $0x20] sm:$0xff] (!%p106_p9)  ;;  %v329_v23 = vld [vmem:[%s3996_s1 + $0x38] sm:$0xff] (!%p106_p9)  ;;  %v328_v24 = vld [vmem:[%s3996_s1 + $0x30] sm:$0xff] (!%p106_p9)  ;;  %p2431_p11 = pnand (!%p106_p9), %p2430_p10, %p2556_p5  ;;  %p2437_p0 = scmp.lt.s32.totalorder (!%p106_p9), %s2435_s17, %s2429_s8 }
  0x15   : > { %v331_v25 = vld [vmem:[%s3996_s1 + $0x48] sm:$0xff]  ;;  %v330_v26 = vld [vmem:[%s3996_s1 + $0x40] sm:$0xff]  ;;  %v333_v27 = vld [vmem:[%s3996_s1 + $0x58] sm:$0xff]  ;;  %v178_v40 = vcvt.s32.f32 %v144_v37  ;;  %v186_v49 = vcvt.s32.f32 %v145_v43 }
  0x16   : > { %v332_v28 = vld [vmem:[%s3996_s1 + $0x50] sm:$0xff]  ;;  %v335_v29 = vld [vmem:[%s3996_s1 + $0x68] sm:$0xff]  ;;  %v334_v30 = vld [vmem:[%s3996_s1 + $0x60] sm:$0xff]  ;;  %p2432_p12 = pneg %p2431_p11  ;;  %p2438_p1 = por %p2437_p0, %p2436_p13 }
  0x17   : > { %253 = vperm.xlu1 %2364, %v215_v5   ;;  %248 = vperm.xlu0 %2363, %v214_v6   ;;  %v337_v31 = vld [vmem:[%s3996_s1 + $0x78] sm:$0xff]  ;;  %v336_v32 = vld [vmem:[%s3996_s1 + $0x70] sm:$0xff]  ;;  %v194_v44 = vadd.f32 1.0, %v178_v40  ;;  %v202_v54 = vadd.f32 1.0, %v186_v49 }
  0x18   : > { %p2439_p2 = pnand %p2438_p1, %p2432_p12 }
  0x1b   : > { %263 = vperm.xlu1 %2364, %v217_v7   ;;  %258 = vperm.xlu0 %2363, %v216_v8  }
  0x1f   : > { %273 = vperm.xlu1 %2364, %v219_v9   ;;  %268 = vperm.xlu0 %2363, %v218_v10  }
  0x23   : > { %283 = vperm.xlu1 %2364, %v221_v11   ;;  %278 = vperm.xlu0 %2363, %v220_v12  }
  0x27   : > { %293 = vperm.xlu1 %2364, %v223_v13   ;;  %288 = vperm.xlu0 %2363, %v222_v14  }
  0x2b   : > { %303 = vperm.xlu1 %2364, %v225_v15   ;;  %298 = vperm.xlu0 %2363, %v224_v16  }
  0x2f   : > { %345 = vperm.xlu1 %2364, %v323_v17   ;;  %340 = vperm.xlu0 %2363, %v322_v18  }
  0x33   : > { %355 = vperm.xlu1 %2364, %v325_v19   ;;  %350 = vperm.xlu0 %2363, %v324_v20  }
  0x37   : > { %365 = vperm.xlu1 %2364, %v327_v21   ;;  %360 = vperm.xlu0 %2363, %v326_v22  }
  0x3b   : > { %375 = vperm.xlu1 %2364, %v329_v23   ;;  %370 = vperm.xlu0 %2363, %v328_v24  }
  0x3f   : > { %385 = vperm.xlu1 %2364, %v331_v25   ;;  %380 = vperm.xlu0 %2363, %v330_v26  }
  0x43   : > { %395 = vperm.xlu1 %2364, %v333_v27   ;;  %390 = vperm.xlu0 %2363, %v332_v28  }
  0x47   : > { %405 = vperm.xlu1 %2364, %v335_v29   ;;  %400 = vperm.xlu0 %2363, %v334_v30  }
  0x4b   : > { %415 = vperm.xlu1 %2364, %v337_v31   ;;  %410 = vperm.xlu0 %2363, %v336_v32  }
  0x8e   : > { %v239_v38 = vpop.permute.xlu1 %238  ;;  %v229_v39 = vpop.permute.xlu0 %228 }
  0x8f   : > { %v306_v7 = vmul.f32 %v229_v39, %v194_v44  ;;  %v308_v34 = vmul.f32 %v239_v38, %v194_v44 }
  0x92   : > { %v244_v41 = vpop.permute.xlu1 %243  ;;  %v234_v42 = vpop.permute.xlu0 %233 }
  0x93   : > { %v307_v8 = vmul.f32 %v234_v42, %v194_v44  ;;  %v309_v13 = vmul.f32 %v244_v41, %v194_v44 }
  0x96   : > { %v254_v45 = vpop.permute.xlu1 %253  ;;  %v249_v46 = vpop.permute.xlu0 %248 }
  0x97   : > { %v2667_v47 = vmul.f32 %v254_v45, %v194_v44  ;;  %v2669_v48 = vmul.f32 %v249_v46, %v194_v44 }
  0x9a   : > { %v264_v50 = vpop.permute.xlu1 %263  ;;  %v259_v51 = vpop.permute.xlu0 %258 }
  0x9b   : > { %v2671_v52 = vmul.f32 %v264_v50, %v194_v44  ;;  %v2673_v53 = vmul.f32 %v259_v51, %v194_v44  ;;  %v2494_v44 = vmov 683565275  }
  0x9e   : > { %v274_v55 = vpop.permute.xlu1 %273  ;;  %v269_v56 = vpop.permute.xlu0 %268 }
  0x9f   : > { %v2675_v57 = vmul.f32 %v274_v55, %v202_v54  ;;  %v2677_v58 = vmul.f32 %v269_v56, %v202_v54  ;;  %v2496_v56 = vmov 2131351028  }
  0xa2   : > { %v284_v59 = vpop.permute.xlu1 %283  ;;  %v279_v60 = vpop.permute.xlu0 %278 }
  0xa3   : > { %v2679_v61 = vmul.f32 %v284_v59, %v202_v54  ;;  %v2681_v62 = vmul.f32 %v279_v60, %v202_v54  ;;  %v2497_v60 = vmov 2102212464  }
  0xa6   : > { %v294_v63 = vpop.permute.xlu1 %293  ;;  %v289_v0 = vpop.permute.xlu0 %288 }
  0xa7   : > { %v2683_v1 = vmul.f32 %v294_v63, %v202_v54  ;;  %v2685_v2 = vmul.f32 %v289_v0, %v202_v54  ;;  %v2498_v0 = vmov 920167782  }
  0xaa   : > { %v304_v3 = vpop.permute.xlu1 %303  ;;  %v299_v4 = vpop.permute.xlu0 %298 }
  0xab   : > { %v2687_v5 = vmul.f32 %v304_v3, %v202_v54  ;;  %v2689_v6 = vmul.f32 %v299_v4, %v202_v54  ;;  %v2495_v54 = vmov 2475754826  }
  0xae   : > { %v346_v9 = vpop.permute.xlu1 %345  ;;  %v341_v10 = vpop.permute.xlu0 %340 }
  0xaf   : > { %v2691_v11 = vadd.f32 %v346_v9, %v307_v8  ;;  %v2693_v12 = vadd.f32 %v341_v10, %v306_v7 }
  0xb1   : > { %v538_v14 = vand.u32 2147483647, %v2691_v11  ;;  %v541_v15 = vand.u32 2139095040, %v2691_v11  ;;  %v434_v16 = vand.u32 2147483647, %v2693_v12  ;;  %v437_v17 = vand.u32 2139095040, %v2693_v12 }
  0xb2   : > { %v356_v18 = vpop.permute.xlu1 %355  ;;  %v351_v33 = vpop.permute.xlu0 %350  ;;  %vm540_vm13 = vcmp.lt.s32.totalorder %v2691_v11, 0  ;;  %vm436_vm15 = vcmp.lt.s32.totalorder %v2693_v12, 0 }
  0xb3   : > { %v542_v19 = vshrl.u32 %v541_v15, 23  ;;  %v545_v20 = vand.u32 8388607, %v538_v14  ;;  %v2701_v21 = vadd.f32 %v356_v18, %v309_v13  ;;  %v438_v22 = vshrl.u32 %v437_v17, 23 }
  0xb4   : > { %v441_v23 = vand.u32 8388607, %v434_v16  ;;  %v2707_v41 = vadd.f32 %v351_v33, %v308_v34  ;;  %v2499_v13 = vmov 1326507024   ;;  %vm2814_vm14 = vcmp.le.f32.partialorder %v538_v14, 0.7853982 }
  0xb5   : > { %v2186_v24 = vadd.s32 4294967169, %v542_v19  ;;  %v2182_v25 = vadd.s32 4294967169, %v438_v22  ;;  %v749_v26 = vand.u32 2139095040, %v2701_v21  ;;  %v546_v27 = vor.u32 8388608, %v545_v20 }
  0xb6   : > { %v442_v29 = vor.u32 8388608, %v441_v23  ;;  %v746_v31 = vand.u32 2147483647, %v2701_v21 }
  0xb7   : > { %v548_v28 = vadd.s32 1, %v2186_v24  ;;  %v444_v30 = vadd.s32 1, %v2182_v25  ;;  %v750_v32 = vshrl.u32 %v749_v26, 23  ;;  %v2709_v42 = vshll.u32 %v546_v27, 8 }
  0xb8   : > { %v2713_v45 = vshll.u32 %v442_v29, 8  ;;  %v2717_v46 = vand.u32 8388607, %v746_v31 }
  0xb9   : > { %vm549_vm0 = vcmp.gt.s32.totalorder %v548_v28, 0  ;;  %vm445_vm1 = vcmp.gt.s32.totalorder %v444_v30, 0  ;;  %v2194_v36 = vadd.s32 4294967169, %v750_v32 }
  0xba   : > { %v550_v35 = vsel %vm549_vm0, %v548_v28, 0  ;;  %v446_v40 = vsel %vm445_vm1, %v444_v30, 0 }
  0xbb   : > { %v551_v37 = vshrl.u32 %v550_v35, 5  ;;  %v552_v39 = vand.u32 31, %v550_v35  ;;  %v2711_v43 = vshrl.u32 %v446_v40, 5  ;;  %v448_v50 = vand.u32 31, %v446_v40 }
  0xbc   : > { %v2720_v51 = vadd.s32 1, %v2194_v36 }
  0xbd   : > { %v553_v38 = vsub.s32 32, %v552_v39  ;;  %v555_v49 = vshll.u32 %v2494_v44, %v552_v39  ;;  %v558_v55 = vshll.u32 %v2495_v54, %v552_v39  ;;  %v561_v59 = vshll.u32 %v2496_v56, %v552_v39 }
  0xbe   : > { %v564_v63 = vshll.u32 %v2497_v60, %v552_v39  ;;  %v567_v3 = vshll.u32 %v2498_v0, %v552_v39  ;;  %vm570_vm2 = vcmp.lt.s32.totalorder %v551_v37, 1  ;;  %vm571_vm3 = vcmp.lt.s32.totalorder %v551_v37, 2 }
  0xbf   : > { %v556_v4 = vshrl.u32 %v2495_v54, %v553_v38  ;;  %v559_v7 = vshrl.u32 %v2496_v56, %v553_v38  ;;  %v562_v8 = vshrl.u32 %v2497_v60, %v553_v38  ;;  %v554_v9 = vshrl.u32 %v2494_v44, %v553_v38 }
  0xc0   : > { %v565_v10 = vshrl.u32 %v2498_v0, %v553_v38  ;;  %v568_v15 = vshrl.u32 %v2499_v13, %v553_v38  ;;  %v449_v20 = vsub.s32 32, %v448_v50  ;;  %vm572_vm4 = vcmp.lt.s32.totalorder %v551_v37, 3 }
  0xc1   : > { %v557_v17 = vor.u32 %v556_v4, %v555_v49  ;;  %v560_v18 = vor.u32 %v559_v7, %v558_v55  ;;  %v563_v19 = vor.u32 %v562_v8, %v561_v59  ;;  %vm573_vm5 = vcmp.lt.s32.totalorder %v551_v37, 4 }
  0xc2   : > { %v566_v22 = vor.u32 %v565_v10, %v564_v63  ;;  %v569_v23 = vor.u32 %v568_v15, %v567_v3  ;;  %v451_v32 = vshll.u32 %v2494_v44, %v448_v50  ;;  %v452_v35 = vshrl.u32 %v2495_v54, %v449_v20 }
  0xc3   : > { %v574_v24 = vsel %vm570_vm2, %v554_v9, %v557_v17  ;;  %v575_v25 = vsel %vm573_vm5, %v563_v19, 2102212464  ;;  %v578_v26 = vsel %vm570_vm2, %v557_v17, %v560_v18  ;;  %v582_v27 = vsel %vm570_vm2, %v560_v18, %v563_v19 }
  0xc4   : > { %v576_v28 = vsel %vm572_vm4, %v560_v18, %v575_v25  ;;  %v579_v29 = vsel %vm573_vm5, %v566_v22, 920167782  ;;  %v583_v30 = vsel %vm573_vm5, %v569_v23, 1326507024  ;;  %v454_v36 = vshll.u32 %v2495_v54, %v448_v50 }
  0xc5   : > { %v580_v33 = vsel %vm572_vm4, %v563_v19, %v579_v29  ;;  %v584_v34 = vsel %vm572_vm4, %v566_v22, %v583_v30  ;;  %v577_v39 = vsel %vm571_vm3, %v574_v24, %v576_v28  ;;  %v455_v49 = vshrl.u32 %v2496_v56, %v449_v20 }
  0xc6   : > { %v581_v40 = vsel %vm571_vm3, %v578_v26, %v580_v33  ;;  %v585_v38 = vsel %vm571_vm3, %v582_v27, %v584_v34  ;;  %v453_v4 = vor.u32 %v452_v35, %v451_v32  ;;  %v457_v8 = vshll.u32 %v2496_v56, %v448_v50 }
  0xc7   : > { %v2743_v55 = vmul.u32.u64.low %v2709_v42, %v585_v38  ;;  %v2744_v59 = vmul.u32.u64.high %v2709_v42, %v585_v38, %v2743_v55  ;;  %v2747_v63 = vmul.u32.u64.low %v2709_v42, %v581_v40  ;;  %v2748_v3 = vmul.u32.u64.high %v2709_v42, %v581_v40, %v2747_v63 }
  0xc8   : > { %v456_v7 = vor.u32 %v455_v49, %v454_v36  ;;  %v458_v9 = vshrl.u32 %v2497_v60, %v449_v20  ;;  %v450_v10 = vshrl.u32 %v2494_v44, %v449_v20  ;;  %v460_v37 = vshll.u32 %v2497_v60, %v448_v50 }
  0xc9   : > { %v461_v15 = vshrl.u32 %v2498_v0, %v449_v20  ;;  %v464_v17 = vshrl.u32 %v2499_v13, %v449_v20  ;;  %v593_v18 = vmul.u32 %v2709_v42, %v577_v39  ;;  %v463_v22 = vshll.u32 %v2498_v0, %v448_v50 }
  0xca   : > { %v459_v19 = vor.u32 %v458_v9, %v457_v8  ;;  %vm466_vm6 = vcmp.lt.s32.totalorder %v2711_v43, 1  ;;  %vm595_vm7 = vc.u32 %v2744_v59, %v2747_v63  ;;  %v596_v23 = vadd.s32 1, %v2748_v3 }
  0xcb   : > { %v462_v24 = vor.u32 %v461_v15, %v460_v37  ;;  %vm467_vm8 = vcmp.lt.s32.totalorder %v2711_v43, 2  ;;  %v465_v25 = vor.u32 %v464_v17, %v463_v22  ;;  %vm468_vm9 = vcmp.lt.s32.totalorder %v2711_v43, 3 }
  0xcc   : > { %vm469_vm10 = vcmp.lt.s32.totalorder %v2711_v43, 4  ;;  %v474_v20 = vsel %vm466_vm6, %v453_v4, %v456_v7  ;;  %v597_v42 = vsel %vm595_vm7, %v596_v23, %v2748_v3  ;;  %v478_v50 = vsel %vm466_vm6, %v456_v7, %v459_v19 }
  0xcd   : > { %v471_v26 = vsel %vm469_vm10, %v459_v19, 2102212464  ;;  %v475_v27 = vsel %vm469_vm10, %v462_v24, 920167782  ;;  %v598_v28 = vadd.s32 %v597_v42, %v593_v18  ;;  %v470_v29 = vsel %vm466_vm6, %v450_v10, %v453_v4 }
  0xce   : > { %v476_v30 = vsel %vm468_vm9, %v459_v19, %v475_v27  ;;  %v479_v32 = vsel %vm469_vm10, %v465_v25, 1326507024  ;;  %v472_v33 = vsel %vm468_vm9, %v456_v7, %v471_v26  ;;  %vm757_vm11 = vcmp.gt.s32.totalorder %v2720_v51, 0 }
  0xcf   : > { %v477_v34 = vsel %vm467_vm8, %v474_v20, %v476_v30  ;;  %v480_v35 = vsel %vm468_vm9, %v462_v24, %v479_v32  ;;  %v599_v36 = vadd.s32 536870912, %v598_v28  ;;  %v758_v3 = vsel %vm757_vm11, %v2720_v51, 0 }
  0xd0   : > { %v481_v39 = vsel %vm467_vm8, %v478_v50, %v480_v35  ;;  %v2771_v40 = vmul.u32.u64.low %v2713_v45, %v477_v34  ;;  %v2772_v38 = vmul.u32.u64.high %v2713_v45, %v477_v34, %v2771_v40  ;;  %v473_v7 = vsel %vm467_vm8, %v470_v29, %v472_v33 }
  0xd1   : > { %v2776_v49 = vmul.u32.u64.low %v2713_v45, %v481_v39  ;;  %v2777_v55 = vmul.u32.u64.high %v2713_v45, %v481_v39, %v2776_v49  ;;  %v600_v4 = vshrl.u32 %v599_v36, 30  ;;  %v760_v8 = vand.u32 31, %v758_v3 }
  0xd2   : > { %v645_v9 = vand.u32 2139095040, %v2707_v41  ;;  %v492_v37 = vadd.s32 1, %v2772_v38  ;;  %v754_v15 = vor.u32 8388608, %v2717_v46  ;;  %v489_v17 = vmul.u32 %v2713_v45, %v473_v7 }
  0xd3   : > { %v601_v10 = vshll.u32 %v600_v4, 30  ;;  %vm491_vm12 = vc.u32 %v2777_v55, %v2771_v40  ;;  %v761_v18 = vsub.s32 32, %v760_v8  ;;  %v642_v23 = vand.u32 2147483647, %v2707_v41 }
  0xd4   : > { %v493_v51 = vsel %vm491_vm12, %v492_v37, %v2772_v38  ;;  %v646_v43 = vshrl.u32 %v645_v9, 23  ;;  %v594_v24 = vadd.s32 %v2747_v63, %v2744_v59  ;;  %v2795_v25 = vshrl.u32 %v758_v3, 5 }
  0xd5   : > { %v2788_v19 = vsub.s32 %v598_v28, %v601_v10  ;;  %v494_v22 = vadd.s32 %v493_v51, %v489_v17  ;;  %v2797_v45 = vshll.u32 %v754_v15, 8  ;;  %v624_v20 = vsub.s32 4, %v600_v4 }
  0xd6   : > { %v764_v26 = vshrl.u32 %v2495_v54, %v761_v18  ;;  %v767_v27 = vshrl.u32 %v2496_v56, %v761_v18  ;;  %v770_v28 = vshrl.u32 %v2497_v60, %v761_v18  ;;  %v773_v29 = vshrl.u32 %v2498_v0, %v761_v18 }
  0xd7   : > { %v604_v46 = vsub.s32 0, %v2788_v19  ;;  %v495_v42 = vadd.s32 536870912, %v494_v22  ;;  %v2804_v30 = vadd.s32 4294967169, %v646_v43  ;;  %v763_v63 = vshll.u32 %v2494_v44, %v760_v8 }
  0xd8   : > { %v766_v32 = vshll.u32 %v2495_v54, %v760_v8  ;;  %v2810_v33 = vand.u32 8388607, %v642_v23  ;;  %v769_v36 = vshll.u32 %v2496_v56, %v760_v8  ;;  %v772_v39 = vshll.u32 %v2497_v60, %v760_v8 }
  0xd9   : > { %v2187_v50 = vmin.u32 %v604_v46, %v2788_v19  ;;  %v496_v59 = vshrl.u32 %v495_v42, 30  ;;  %v776_v38 = vshrl.u32 %v2499_v13, %v761_v18  ;;  %v625_v49 = vsel %vm540_vm13, %v624_v20, %v600_v4 }
  0xda   : > { %v765_v7 = vor.u32 %v764_v26, %v763_v63  ;;  %v768_v9 = vor.u32 %v767_v27, %v766_v32  ;;  %v771_v14 = vor.u32 %v770_v28, %v769_v36  ;;  %v774_v37 = vor.u32 %v773_v29, %v772_v39 }
  0xdb   : > { %v606_v35 = vclz %v2187_v50  ;;  %v497_v3 = vshll.u32 %v496_v59, 30  ;;  %v775_v15 = vshll.u32 %v2498_v0, %v760_v8  ;;  %v520_v51 = vsub.s32 4, %v496_v59 }
  0xdc   : > { %v762_v43 = vshrl.u32 %v2494_v44, %v761_v18  ;;  %vm778_vm0 = vcmp.lt.s32.totalorder %v2795_v25, 1  ;;  %vm779_vm2 = vcmp.lt.s32.totalorder %v2795_v25, 2  ;;  %vm780_vm3 = vcmp.lt.s32.totalorder %v2795_v25, 3 }
  0xdd   : > { %v2188_v10 = vadd.s32 4294967294, %v606_v35  ;;  %v2825_v17 = vsub.s32 %v494_v22, %v497_v3  ;;  %v777_v46 = vor.u32 %v776_v38, %v775_v15  ;;  %vm2833_vm4 = vcmp.le.f32.partialorder %v434_v16, 0.7853982 }
  0xde   : > { %vm781_vm5 = vcmp.lt.s32.totalorder %v2795_v25, 4  ;;  %v786_v18 = vsel %vm778_vm0, %v765_v7, %v768_v9  ;;  %v790_v29 = vsel %vm778_vm0, %v768_v9, %v771_v14  ;;  %v627_v39 = vsel %vm2814_vm14, 0, %v625_v49 }
  0xdf   : > { %vm2189_vm1 = vcmp.lt.s32.totalorder %v2188_v10, 0  ;;  %v500_v8 = vsub.s32 0, %v2825_v17  ;;  %v783_v26 = vsel %vm781_vm5, %v771_v14, 2102212464  ;;  %v787_v27 = vsel %vm781_vm5, %v774_v37, 920167782 }
  0xe0   : > { %v609_v4 = vsel %vm2189_vm1, 0, %v2188_v10  ;;  %v788_v16 = vsel %vm780_vm3, %v771_v14, %v787_v27  ;;  %v791_v36 = vsel %vm781_vm5, %v777_v46, 1326507024  ;;  %v784_v3 = vsel %vm780_vm3, %v768_v9, %v783_v26 }
  0xe1   : > { %v610_v22 = vsub.s32 32, %v609_v4  ;;  %v614_v42 = vsub.s32 4294967266, %v609_v4  ;;  %v611_v50 = vshll.u32 %v2788_v19, %v609_v4  ;;  %v2183_v28 = vmin.u32 %v500_v8, %v2825_v17 }
  0xe2   : > { %v789_v35 = vsel %vm779_vm2, %v786_v18, %v788_v16  ;;  %v782_v19 = vsel %vm778_vm0, %v762_v43, %v765_v7  ;;  %v792_v14 = vsel %vm780_vm3, %v774_v37, %v791_v36  ;;  %v490_v37 = vadd.s32 %v2771_v40, %v2777_v55  ;;  %v366_v40 = vpop.permute.xlu1 %365 }
  0xe3   : > { %v612_v63 = vshrl.u32 %v594_v24, %v610_v22  ;;  %v615_v32 = vadd.s32 127, %v614_v42  ;;  %v502_v38 = vclz %v2183_v28  ;;  %v521_v24 = vsel %vm436_vm15, %v520_v51, %v496_v59 }
  0xe4   : > { %v793_v46 = vsel %vm779_vm2, %v790_v29, %v792_v14  ;;  %v2862_v49 = vmul.u32.u64.low %v2797_v45, %v789_v35  ;;  %v2863_v8 = vmul.u32.u64.high %v2797_v45, %v789_v35, %v2862_v49  ;;  %v785_v9 = vsel %vm779_vm2, %v782_v19, %v784_v3 }
  0xe5   : > { %v613_v10 = vor.u32 %v612_v63, %v611_v50  ;;  %v616_v15 = vshll.u32 %v615_v32, 23  ;;  %v2184_v4 = vadd.s32 4294967294, %v502_v38  ;;  %v631_v59 = vadd.s32 3, %v627_v39 }
  0xe6   : > { %v2869_v43 = vmul.u32.u64.low %v2797_v45, %v793_v46  ;;  %v2870_v18 = vmul.u32.u64.high %v2797_v45, %v793_v46, %v2869_v43  ;;  %v652_v51 = vadd.s32 1, %v2804_v30  ;;  %v523_v27 = vsel %vm2833_vm4, 0, %v521_v24 }
  0xe7   : > { %v617_v7 = vor.u32 4788187, %v616_v15  ;;  %vm2185_vm6 = vcmp.lt.s32.totalorder %v2184_v4, 0  ;;  %v620_v42 = vcvt.s32.f32 %v613_v10  ;;  %v801_v28 = vmul.u32 %v2797_v45, %v785_v9  ;;  %v361_v45 = vpop.permute.xlu0 %360 }
  0xe8   : > { %v505_v26 = vsel %vm2185_vm6, 0, %v2184_v4  ;;  %v804_v16 = vadd.s32 1, %v2863_v8  ;;  %vm803_vm7 = vc.u32 %v2870_v18, %v2862_v49  ;;  %vm653_vm8 = vcmp.gt.s32.totalorder %v652_v51, 0 }
  0xe9   : > { %v618_v22 = vand.u32 2147483647, %v617_v7  ;;  %v506_v50 = vsub.s32 32, %v505_v26  ;;  %v510_v25 = vsub.s32 4294967266, %v505_v26  ;;  %v507_v63 = vshll.u32 %v2825_v17, %v505_v26 }
  0xea   : > { %v805_v32 = vsel %vm803_vm7, %v804_v16, %v2863_v8  ;;  %v654_v35 = vsel %vm653_vm8, %v652_v51, 0  ;;  %v527_v39 = vadd.s32 3, %v523_v27  ;;  %v2884_v15 = vadd.f32 %v366_v40, %v2667_v47 }
  0xeb   : > { %v621_v29 = vmul.f32 %v620_v42, %v618_v22  ;;  %v508_v55 = vshrl.u32 %v490_v37, %v506_v50  ;;  %v511_v30 = vadd.s32 127, %v510_v25  ;;  %v806_v38 = vadd.s32 %v805_v32, %v801_v28 }
  0xec   : > { %v656_v19 = vand.u32 31, %v654_v35  ;;  %v2891_v46 = vand.u32 3, %v631_v59  ;;  %vm748_vm9 = vcmp.lt.s32.totalorder %v2701_v21, 0  ;;  %v2895_v7 = vadd.f32 %v361_v45, %v2669_v48 }
  0xed   : > { %v622_v36 = vxor.u32 2147483648, %v621_v29  ;;  %v509_v3 = vor.u32 %v508_v55, %v507_v63  ;;  %v512_v10 = vshll.u32 %v511_v30, 23  ;;  %v807_v24 = vadd.s32 536870912, %v806_v38 }
  0xee   : > { %v657_v14 = vsub.s32 32, %v656_v19  ;;  %v2897_v47 = vand.u32 3, %v527_v39  ;;  %v650_v43 = vor.u32 8388608, %v2810_v33  ;;  %v957_v34 = vand.u32 2139095040, %v2884_v15 }
  0xef   : > { %v623_v17 = vsel %vm540_vm13, %v622_v36, %v621_v29  ;;  %v513_v8 = vor.u32 4788187, %v512_v10  ;;  %v808_v9 = vshrl.u32 %v807_v24, 30  ;;  %v516_v51 = vcvt.s32.f32 %v509_v3 }
  0xf0   : > { %v626_v4 = vsel %vm2814_vm14, %v2691_v11, %v623_v17  ;;  %vm2903_vm10 = vcmp.le.f32.partialorder %v746_v31, 0.7853982  ;;  %v2907_v48 = vshrl.u32 %v654_v35, 5  ;;  %v660_v42 = vshrl.u32 %v2495_v54, %v657_v14 }
  0xf1   : > { %2365 = vcosq.f32 %v626_v4  ;;  %v514_v37 = vand.u32 2147483647, %v513_v8  ;;  %v809_v22 = vshll.u32 %v808_v9, 30  ;;  %v663_v26 = vshrl.u32 %v2496_v56, %v657_v14 }
  0xf2   : > { %2367 = vsinq.f32 %v626_v4  ;;  %v666_v33 = vshrl.u32 %v2497_v60, %v657_v14  ;;  %v668_v50 = vshll.u32 %v2497_v60, %v656_v19  ;;  %v669_v25 = vshrl.u32 %v2498_v0, %v657_v14 }
  0xf3   : > { %v517_v27 = vmul.f32 %v516_v51, %v514_v37  ;;  %vm637_vm11 = vcmp.eq.s32.totalorder %v2891_v46, 2  ;;  %v2915_v31 = vsub.s32 %v806_v38, %v809_v22  ;;  %v832_v28 = vsub.s32 4, %v808_v9 }
  0xf4   : > { %v659_v16 = vshll.u32 %v2494_v44, %v656_v19  ;;  %v662_v29 = vshll.u32 %v2495_v54, %v656_v19  ;;  %vm634_vm12 = vcmp.eq.s32.totalorder %v2891_v46, 0  ;;  %v665_v40 = vshll.u32 %v2496_v56, %v656_v19 }
  0xf5   : > { %v518_v63 = vxor.u32 2147483648, %v517_v27  ;;  %v670_v55 = vor.u32 %v669_v25, %v668_v50  ;;  %v672_v30 = vshrl.u32 %v2499_v13, %v657_v14  ;;  %vm633_vm13 = vcmp.lt.s32.totalorder %v2891_v46, 2 }
  0xf6   : > { %v802_v32 = vadd.s32 %v2862_v49, %v2870_v18  ;;  %v812_v35 = vsub.s32 0, %v2915_v31  ;;  %v661_v36 = vor.u32 %v660_v42, %v659_v16  ;;  %v664_v39 = vor.u32 %v663_v26, %v662_v29 }
  0xf7   : > { %vm630_vm14 = vweird.f32 %v2691_v11  ;;  %v519_v38 = vsel %vm436_vm15, %v518_v63, %v517_v27  ;;  %v667_v45 = vor.u32 %v666_v33, %v665_v40  ;;  %v671_v3 = vshll.u32 %v2498_v0, %v656_v19 }
  0xf8   : > { %v2930_v10 = vshll.u32 %v650_v43, 8  ;;  %v522_v49 = vsel %vm2833_vm4, %v2693_v12, %v519_v38  ;;  %v2195_v18 = vmin.u32 %v812_v35, %v2915_v31  ;;  %v833_v17 = vsel %vm748_vm9, %v832_v28, %v808_v9 }
  0xf9   : > { %vm677_vm0 = vcmp.lt.s32.totalorder %v2907_v48, 4  ;;  %2369 = vcosq.f32 %v522_v49  ;;  %v673_v24 = vor.u32 %v672_v30, %v671_v3  ;;  %vm674_vm15 = vcmp.lt.s32.totalorder %v2907_v48, 1 }
  0xfa   : > { %v683_v19 = vsel %vm677_vm0, %v670_v55, 920167782  ;;  %2371 = vsinq.f32 %v522_v49  ;;  %v814_v8 = vclz %v2195_v18  ;;  %vm676_vm1 = vcmp.lt.s32.totalorder %v2907_v48, 3 }
  0xfb   : > { %v2366_v4 = vpop.eup %2365  ;;  %v682_v20 = vsel %vm674_vm15, %v661_v36, %v664_v39  ;;  %v835_v37 = vsel %vm2903_vm10, 0, %v833_v17  ;;  %v658_v51 = vshrl.u32 %v2494_v44, %v657_v14  ;;  %v684_v22 = vsel %vm676_vm1, %v667_v45, %v683_v19 }
  0xfc   : > { %v2368_v43 = vpop.eup %2367  ;;  %v638_v9 = vxor.u32 2147483648, %v2366_v4  ;;  %v2196_v26 = vadd.s32 4294967294, %v814_v8  ;;  %vm675_vm2 = vcmp.lt.s32.totalorder %v2907_v48, 2  ;;  %v679_v27 = vsel %vm677_vm0, %v667_v45, 2102212464 }
  0xfd   : > { %v635_v42 = vxor.u32 2147483648, %v2368_v43  ;;  %v685_v50 = vsel %vm675_vm2, %v682_v20, %v684_v22  ;;  %v686_v25 = vsel %vm674_vm15, %v664_v39, %v667_v45  ;;  %v687_v14 = vsel %vm677_vm0, %v673_v24, 1326507024 }
  0xfe   : > { %v639_v33 = vsel %vm637_vm11, %v638_v9, %v2368_v43  ;;  %vm2197_vm3 = vcmp.lt.s32.totalorder %v2196_v26, 0  ;;  %v688_v16 = vsel %vm676_vm1, %v670_v55, %v687_v14  ;;  %v958_v29 = vshrl.u32 %v957_v34, 23 }
  0xff   : > { %v636_v28 = vsel %vm634_vm12, %v2366_v4, %v635_v42  ;;  %v817_v40 = vsel %vm2197_vm3, 0, %v2196_v26  ;;  %v678_v30 = vsel %vm674_vm15, %v658_v51, %v661_v36  ;;  %v689_v35 = vsel %vm675_vm2, %v686_v25, %v688_v16 }
 0x100   : > { %v640_v63 = vsel %vm633_vm13, %v636_v28, %v639_v33  ;;  %vm526_vm4 = vweird.f32 %v2693_v12  ;;  %v818_v45 = vsub.s32 32, %v817_v40  ;;  %v822_v3 = vsub.s32 4294967266, %v817_v40 }
 0x101   : > { %v641_v38 = vsel %vm630_vm14, nan, %v640_v63  ;;  %v680_v34 = vsel %vm676_vm1, %v664_v39, %v679_v27  ;;  %v2983_v46 = vmul.u32.u64.low %v2930_v10, %v689_v35  ;;  %v2984_v55 = vmul.u32.u64.high %v2930_v10, %v689_v35, %v2983_v46 }
 0x102   : > { %2099 = vst [vmem:[%s2979_s30 + $0x8] sm:$0xff] %v641_v38  ;;  %v2987_v36 = vmul.u32.u64.low %v2930_v10, %v685_v50  ;;  %v2988_v49 = vmul.u32.u64.high %v2930_v10, %v685_v50, %v2987_v36  ;;  %v819_v11 = vshll.u32 %v2915_v31, %v817_v40  ;;  %v820_v18 = vshrl.u32 %v802_v32, %v818_v45 }
 0x103   : > { %v823_v17 = vadd.s32 127, %v822_v3  ;;  %v2202_v24 = vadd.s32 4294967169, %v958_v29  ;;  %v2370_v19 = vpop.eup %2369  ;;  %vm529_vm5 = vcmp.lt.s32.totalorder %v2897_v47, 2  ;;  %vm530_vm6 = vcmp.eq.s32.totalorder %v2897_v47, 0 }
 0x104   : > { %vm533_vm7 = vcmp.eq.s32.totalorder %v2897_v47, 2  ;;  %v681_v39 = vsel %vm675_vm2, %v678_v30, %v680_v34  ;;  %v2372_v4 = vpop.eup %2371  ;;  %v534_v8 = vxor.u32 2147483648, %v2370_v19  ;;  %v821_v20 = vor.u32 %v820_v18, %v819_v11 }
 0x105   : > { %v824_v43 = vshll.u32 %v823_v17, 23  ;;  %v964_v9 = vadd.s32 1, %v2202_v24  ;;  %v531_v51 = vxor.u32 2147483648, %v2372_v4  ;;  %v839_v31 = vadd.s32 3, %v835_v37 }
 0x106   : > { %vm699_vm8 = vc.u32 %v2984_v55, %v2987_v36  ;;  %v700_v32 = vadd.s32 1, %v2988_v49  ;;  %v535_v22 = vsel %vm533_vm7, %v534_v8, %v2372_v4  ;;  %v697_v26 = vmul.u32 %v2930_v10, %v681_v39 }
 0x107   : > { %v825_v42 = vor.u32 4788187, %v824_v43  ;;  %vm965_vm11 = vcmp.gt.s32.totalorder %v964_v9, 0  ;;  %v532_v48 = vsel %vm530_vm6, %v2370_v19, %v531_v51  ;;  %v954_v33 = vand.u32 2147483647, %v2884_v15 }
 0x108   : > { %v701_v27 = vsel %vm699_vm8, %v700_v32, %v2988_v49  ;;  %v966_v50 = vsel %vm965_vm11, %v964_v9, 0  ;;  %v536_v37 = vsel %vm529_vm5, %v532_v48, %v535_v22  ;;  %v828_v14 = vcvt.s32.f32 %v821_v20 }
 0x109   : > { %v826_v25 = vand.u32 2147483647, %v825_v42  ;;  %v702_v28 = vadd.s32 %v701_v27, %v697_v26  ;;  %v537_v16 = vsel %vm526_vm4, nan, %v536_v37  ;;  %v968_v29 = vand.u32 31, %v966_v50 }
 0x10a   : > { %2098 = vst [vmem:[%s2979_s30] sm:$0xff] %v537_v16  ;;  %v3010_v63 = vand.u32 3, %v839_v31  ;;  %v961_v30 = vand.u32 8388607, %v954_v33  ;;  %v967_v35 = vshrl.u32 %v966_v50, 5  ;;  %v853_v47 = vand.u32 2139095040, %v2895_v7 }
 0x10b   : > { %v829_v10 = vmul.f32 %v828_v14, %v826_v25  ;;  %v703_v40 = vadd.s32 536870912, %v702_v28  ;;  %v969_v38 = vsub.s32 32, %v968_v29  ;;  %v971_v34 = vshll.u32 %v2494_v44, %v968_v29 }
 0x10c   : > { %v974_v12 = vshll.u32 %v2495_v54, %v968_v29  ;;  %v977_v11 = vshll.u32 %v2496_v56, %v968_v29  ;;  %v980_v19 = vshll.u32 %v2497_v60, %v968_v29  ;;  %v962_v51 = vor.u32 8388608, %v961_v30 }
 0x10d   : > { %v830_v45 = vxor.u32 2147483648, %v829_v10  ;;  %v3015_v3 = vshrl.u32 %v703_v40, 30  ;;  %v972_v46 = vshrl.u32 %v2495_v54, %v969_v38  ;;  %v975_v49 = vshrl.u32 %v2496_v56, %v969_v38 }
 0x10e   : > { %v978_v18 = vshrl.u32 %v2497_v60, %v969_v38  ;;  %v981_v39 = vshrl.u32 %v2498_v0, %v969_v38  ;;  %v983_v32 = vshll.u32 %v2498_v0, %v968_v29  ;;  %v984_v22 = vshrl.u32 %v2499_v13, %v969_v38 }
 0x10f   : > { %v831_v17 = vsel %vm748_vm9, %v830_v45, %v829_v10  ;;  %v705_v24 = vshll.u32 %v3015_v3, 30  ;;  %v973_v8 = vor.u32 %v972_v46, %v971_v34  ;;  %v976_v20 = vor.u32 %v975_v49, %v974_v12 }
 0x110   : > { %v834_v4 = vsel %vm2903_vm10, %v2701_v21, %v831_v17  ;;  %v979_v43 = vor.u32 %v978_v18, %v977_v11  ;;  %v982_v31 = vor.u32 %v981_v39, %v980_v19  ;;  %v854_v42 = vshrl.u32 %v853_v47, 23 }
 0x111   : > { %2373 = vcosq.f32 %v834_v4  ;;  %v3031_v9 = vsub.s32 %v702_v28, %v705_v24  ;;  %vm986_vm9 = vcmp.lt.s32.totalorder %v967_v35, 1  ;;  %vm988_vm12 = vcmp.lt.s32.totalorder %v967_v35, 3 }
 0x112   : > { %2375 = vsinq.f32 %v834_v4  ;;  %vm989_vm13 = vcmp.lt.s32.totalorder %v967_v35, 4  ;;  %v985_v59 = vor.u32 %v984_v22, %v983_v32  ;;  %v994_v27 = vsel %vm986_vm9, %v973_v8, %v976_v20 }
 0x113   : > { %v708_v26 = vsub.s32 0, %v3031_v9  ;;  %v991_v48 = vsel %vm989_vm13, %v979_v43, 2102212464  ;;  %v995_v50 = vsel %vm989_vm13, %v982_v31, 920167782  ;;  %v970_v25 = vshrl.u32 %v2494_v44, %v969_v38 }
 0x114   : > { %vm987_vm10 = vcmp.lt.s32.totalorder %v967_v35, 2  ;;  %v996_v14 = vsel %vm988_vm12, %v979_v43, %v995_v50  ;;  %v998_v16 = vsel %vm986_vm9, %v976_v20, %v979_v43  ;;  %v999_v29 = vsel %vm989_vm13, %v985_v59, 1326507024 }
 0x115   : > { %v2191_v37 = vmin.u32 %v708_v26, %v3031_v9  ;;  %v997_v28 = vsel %vm987_vm10, %v994_v27, %v996_v14  ;;  %v1002_v10 = vshll.u32 %v962_v51, 8  ;;  %vm644_vm14 = vcmp.lt.s32.totalorder %v2707_v41, 0 }
 0x116   : > { %v990_v30 = vsel %vm986_vm9, %v970_v25, %v973_v8  ;;  %v992_v47 = vsel %vm988_vm12, %v976_v20, %v991_v48  ;;  %vm838_vm0 = vweird.f32 %v2701_v21  ;;  %vm3048_vm15 = vcmp.le.f32.partialorder %v642_v23, 0.7853982 }
 0x117   : > { %v710_v40 = vclz %v2191_v37  ;;  %v728_v45 = vsub.s32 4, %v3015_v3  ;;  %v1000_v34 = vsel %vm988_vm12, %v982_v31, %v999_v29  ;;  %vm841_vm1 = vcmp.lt.s32.totalorder %v3010_v63, 2 }
 0x118   : > { %v3054_v12 = vmul.u32.u64.low %v1002_v10, %v997_v28  ;;  %v3055_v46 = vmul.u32.u64.high %v1002_v10, %v997_v28, %v3054_v12  ;;  %v1001_v11 = vsel %vm987_vm10, %v998_v16, %v1000_v34  ;;  %v2198_v18 = vadd.s32 4294967169, %v854_v42 }
 0x119   : > { %v2192_v49 = vadd.s32 4294967294, %v710_v40  ;;  %vm842_vm2 = vcmp.eq.s32.totalorder %v3010_v63, 0  ;;  %v993_v23 = vsel %vm987_vm10, %v990_v30, %v992_v47  ;;  %vm845_vm3 = vcmp.eq.s32.totalorder %v3010_v63, 2 }
 0x11a   : > { %v3062_v17 = vmul.u32.u64.low %v1002_v10, %v1001_v11  ;;  %v3063_v24 = vmul.u32.u64.high %v1002_v10, %v1001_v11, %v3062_v17  ;;  %v698_v39 = vadd.s32 %v2987_v36, %v2984_v55  ;;  %v860_v4 = vadd.s32 1, %v2198_v18 }
 0x11b   : > { %v2374_v19 = vpop.eup %2373  ;;  %vm2193_vm4 = vcmp.lt.s32.totalorder %v2192_v49, 0  ;;  %v729_v51 = vsel %vm644_vm14, %v728_v45, %v3015_v3  ;;  %v1012_v35 = vadd.s32 1, %v3055_v46  ;;  %v1009_v42 = vmul.u32 %v1002_v10, %v993_v23 }
 0x11c   : > { %v2376_v8 = vpop.eup %2375  ;;  %v846_v20 = vxor.u32 2147483648, %v2374_v19  ;;  %v713_v43 = vsel %vm2193_vm4, 0, %v2192_v49  ;;  %vm1011_vm5 = vc.u32 %v3063_v24, %v3054_v12  ;;  %vm861_vm6 = vcmp.gt.s32.totalorder %v860_v4, 0 }
 0x11d   : > { %v843_v31 = vxor.u32 2147483648, %v2376_v8  ;;  %v714_v32 = vsub.s32 32, %v713_v43  ;;  %v718_v22 = vsub.s32 4294967266, %v713_v43  ;;  %v715_v59 = vshll.u32 %v3031_v9, %v713_v43 }
 0x11e   : > { %v847_v26 = vsel %vm845_vm3, %v846_v20, %v2376_v8  ;;  %v1013_v3 = vsel %vm1011_vm5, %v1012_v35, %v3055_v46  ;;  %v850_v37 = vand.u32 2147483647, %v2895_v7  ;;  %v862_v25 = vsel %vm861_vm6, %v860_v4, 0 }
 0x11f   : > { %v844_v55 = vsel %vm842_vm2, %v2374_v19, %v843_v31  ;;  %v716_v36 = vshrl.u32 %v698_v39, %v714_v32  ;;  %v719_v48 = vadd.s32 127, %v718_v22  ;;  %v1014_v50 = vadd.s32 %v1013_v3, %v1009_v42  ;;  %v376_v31 = vpop.permute.xlu1 %375 }
 0x120   : > { %v848_v27 = vsel %vm841_vm1, %v844_v55, %v847_v26  ;;  %v731_v16 = vsel %vm3048_vm15, 0, %v729_v51  ;;  %v864_v10 = vand.u32 31, %v862_v25  ;;  %v857_v63 = vand.u32 8388607, %v850_v37 }
 0x121   : > { %v849_v9 = vsel %vm838_vm0, nan, %v848_v27  ;;  %v717_v14 = vor.u32 %v716_v36, %v715_v59  ;;  %v720_v28 = vshll.u32 %v719_v48, 23  ;;  %v1015_v29 = vadd.s32 536870912, %v1014_v50 }
 0x122   : > { %2101 = vst [vmem:[%s2979_s30 + $0x18] sm:$0xff] %v849_v9  ;;  %v735_v30 = vadd.s32 3, %v731_v16  ;;  %v865_v45 = vsub.s32 32, %v864_v10  ;;  %v3090_v21 = vshrl.u32 %v862_v25, 5  ;;  %v867_v49 = vshll.u32 %v2494_v44, %v864_v10 }
 0x123   : > { %v721_v40 = vor.u32 4788187, %v720_v28  ;;  %v3086_v47 = vshrl.u32 %v1015_v29, 30  ;;  %v724_v46 = vcvt.s32.f32 %v717_v14  ;;  %v870_v23 = vshll.u32 %v2495_v54, %v864_v10 }
 0x124   : > { %v868_v18 = vshrl.u32 %v2495_v54, %v865_v45  ;;  %v873_v17 = vshll.u32 %v2496_v56, %v864_v10  ;;  %v871_v39 = vshrl.u32 %v2496_v56, %v865_v45  ;;  %v874_v4 = vshrl.u32 %v2497_v60, %v865_v45 }
 0x125   : > { %v722_v34 = vand.u32 2147483647, %v721_v40  ;;  %v1017_v11 = vshll.u32 %v3086_v47, 30  ;;  %v877_v8 = vshrl.u32 %v2498_v0, %v865_v45  ;;  %v3100_v20 = vand.u32 3, %v735_v30 }
 0x126   : > { %v876_v51 = vshll.u32 %v2497_v60, %v864_v10  ;;  %v880_v35 = vshrl.u32 %v2499_v13, %v865_v45  ;;  %v869_v22 = vor.u32 %v868_v18, %v867_v49  ;;  %v872_v42 = vor.u32 %v871_v39, %v870_v23 }
 0x127   : > { %v725_v19 = vmul.f32 %v724_v46, %v722_v34  ;;  %v3102_v43 = vsub.s32 %v1014_v50, %v1017_v11  ;;  %v875_v26 = vor.u32 %v874_v4, %v873_v17  ;;  %v858_v55 = vor.u32 8388608, %v857_v63 }
 0x128   : > { %v878_v36 = vor.u32 %v877_v8, %v876_v51  ;;  %v879_v48 = vshll.u32 %v2498_v0, %v864_v10  ;;  %v866_v27 = vshrl.u32 %v2494_v44, %v865_v45  ;;  %vm882_vm7 = vcmp.lt.s32.totalorder %v3090_v21, 1 }
 0x129   : > { %v726_v32 = vxor.u32 2147483648, %v725_v19  ;;  %v1020_v59 = vsub.s32 0, %v3102_v43  ;;  %v3113_v50 = vadd.f32 %v376_v31, %v2671_v52  ;;  %vm885_vm8 = vcmp.lt.s32.totalorder %v3090_v21, 4 }
 0x12a   : > { %v881_v14 = vor.u32 %v880_v35, %v879_v48  ;;  %v887_v28 = vsel %vm885_vm8, %v875_v26, 2102212464  ;;  %v890_v16 = vsel %vm882_vm7, %v869_v22, %v872_v42  ;;  %v891_v52 = vsel %vm885_vm8, %v878_v36, 920167782 }
 0x12b   : > { %v727_v3 = vsel %vm644_vm14, %v726_v32, %v725_v19  ;;  %v2203_v9 = vmin.u32 %v1020_v59, %v3102_v43  ;;  %vm956_vm11 = vcmp.lt.s32.totalorder %v2884_v15, 0  ;;  %vm884_vm9 = vcmp.lt.s32.totalorder %v3090_v21, 3 }
 0x12c   : > { %v730_v25 = vsel %vm3048_vm15, %v2707_v41, %v727_v3  ;;  %v898_v29 = vshll.u32 %v858_v55, 8  ;;  %vm883_vm12 = vcmp.lt.s32.totalorder %v3090_v21, 2  ;;  %v886_v10 = vsel %vm882_vm7, %v866_v27, %v869_v22  ;;  %v371_v3 = vpop.permute.xlu0 %370 }
 0x12d   : > { %2377 = vcosq.f32 %v730_v25  ;;  %v1022_v38 = vclz %v2203_v9  ;;  %v892_v40 = vsel %vm884_vm9, %v875_v26, %v891_v52  ;;  %v894_v30 = vsel %vm882_vm7, %v872_v42, %v875_v26 }
 0x12e   : > { %2379 = vsinq.f32 %v730_v25  ;;  %v888_v45 = vsel %vm884_vm9, %v872_v42, %v887_v28  ;;  %v893_v34 = vsel %vm883_vm12, %v890_v16, %v892_v40  ;;  %v895_v46 = vsel %vm885_vm8, %v881_v14, 1326507024 }
 0x12f   : > { %v2204_v63 = vadd.s32 4294967294, %v1022_v38  ;;  %v896_v49 = vsel %vm884_vm9, %v878_v36, %v895_v46  ;;  %v3137_v11 = vmul.u32.u64.low %v898_v29, %v893_v34  ;;  %v3138_v18 = vmul.u32.u64.high %v898_v29, %v893_v34, %v3137_v11 }
 0x130   : > { %v1165_v23 = vand.u32 2139095040, %v3113_v50  ;;  %vm3144_vm13 = vcmp.le.f32.partialorder %v954_v33, 0.7853982  ;;  %v1040_v19 = vsub.s32 4, %v3086_v47  ;;  %v897_v39 = vsel %vm883_vm12, %v894_v30, %v896_v49 }
 0x131   : > { %vm2205_vm10 = vcmp.lt.s32.totalorder %v2204_v63, 0  ;;  %vm737_vm14 = vcmp.lt.s32.totalorder %v3100_v20, 2  ;;  %v3152_v8 = vmul.u32.u64.low %v898_v29, %v897_v39  ;;  %v3153_v51 = vmul.u32.u64.high %v898_v29, %v897_v39, %v3152_v8 }
 0x132   : > { %v1025_v4 = vsel %vm2205_vm10, 0, %v2204_v63  ;;  %v1166_v35 = vshrl.u32 %v1165_v23, 23  ;;  %v1010_v31 = vadd.s32 %v3054_v12, %v3063_v24  ;;  %v889_v22 = vsel %vm883_vm12, %v886_v10, %v888_v45 }
 0x133   : > { %v1026_v33 = vsub.s32 32, %v1025_v4  ;;  %v1030_v32 = vsub.s32 4294967266, %v1025_v4  ;;  %vm738_vm0 = vcmp.eq.s32.totalorder %v3100_v20, 0  ;;  %vm741_vm15 = vcmp.eq.s32.totalorder %v3100_v20, 2 }
 0x134   : > { %v908_v42 = vadd.s32 1, %v3138_v18  ;;  %v2210_v26 = vadd.s32 4294967169, %v1166_v35  ;;  %v1027_v59 = vshll.u32 %v3102_v43, %v1025_v4  ;;  %v1162_v48 = vand.u32 2147483647, %v3113_v50 }
 0x135   : > { %v1028_v55 = vshrl.u32 %v1010_v31, %v1026_v33  ;;  %v1031_v36 = vadd.s32 127, %v1030_v32  ;;  %v1041_v24 = vsel %vm956_vm11, %v1040_v19, %v3086_v47  ;;  %v905_v21 = vmul.u32 %v898_v29, %v889_v22 }
 0x136   : > { %vm907_vm1 = vc.u32 %v3153_v51, %v3137_v11  ;;  %v1172_v27 = vadd.s32 1, %v2210_v26  ;;  %v3171_v38 = vadd.f32 %v371_v3, %v2673_v53  ;;  %v1043_v10 = vsel %vm3144_vm13, 0, %v1041_v24 }
 0x137   : > { %v2378_v12 = vpop.eup %2377  ;;  %v1029_v14 = vor.u32 %v1028_v55, %v1027_v59  ;;  %v1032_v28 = vshll.u32 %v1031_v36, 23  ;;  %v909_v43 = vsel %vm907_vm1, %v908_v42, %v3138_v18  ;;  %v1169_v45 = vand.u32 8388607, %v1162_v48 }
 0x138   : > { %v2380_v25 = vpop.eup %2379  ;;  %v742_v9 = vxor.u32 2147483648, %v2378_v12  ;;  %v910_v52 = vadd.s32 %v909_v43, %v905_v21  ;;  %vm1173_vm2 = vcmp.gt.s32.totalorder %v1172_v27, 0  ;;  %vm734_vm3 = vweird.f32 %v2707_v41 }
 0x139   : > { %v739_v16 = vxor.u32 2147483648, %v2380_v25  ;;  %v1033_v29 = vor.u32 4788187, %v1032_v28  ;;  %v1174_v40 = vsel %vm1173_vm2, %v1172_v27, 0  ;;  %v1036_v49 = vcvt.s32.f32 %v1029_v14 }
 0x13a   : > { %v743_v47 = vsel %vm741_vm15, %v742_v9, %v2380_v25  ;;  %v911_v63 = vadd.s32 536870912, %v910_v52  ;;  %v1176_v34 = vand.u32 31, %v1174_v40  ;;  %v1061_v39 = vand.u32 2139095040, %v3171_v38 }
 0x13b   : > { %v740_v30 = vsel %vm738_vm0, %v2378_v12, %v739_v16  ;;  %v1034_v46 = vand.u32 2147483647, %v1033_v29  ;;  %v1047_v8 = vadd.s32 3, %v1043_v10  ;;  %v1170_v31 = vor.u32 8388608, %v1169_v45 }
 0x13c   : > { %v744_v53 = vsel %vm737_vm14, %v740_v30, %v743_v47  ;;  %v3184_v23 = vshrl.u32 %v911_v63, 30  ;;  %v1177_v19 = vsub.s32 32, %v1176_v34  ;;  %v1179_v33 = vshll.u32 %v2494_v44, %v1176_v34 }
 0x13d   : > { %v745_v18 = vsel %vm734_vm3, nan, %v744_v53  ;;  %v1037_v4 = vmul.f32 %v1036_v49, %v1034_v46  ;;  %v1175_v59 = vshrl.u32 %v1174_v40, 5  ;;  %v1182_v55 = vshll.u32 %v2495_v54, %v1176_v34 }
 0x13e   : > { %2100 = vst [vmem:[%s2979_s30 + $0x10] sm:$0xff] %v745_v18  ;;  %v913_v35 = vshll.u32 %v3184_v23, 30  ;;  %v1180_v41 = vshrl.u32 %v2495_v54, %v1177_v19  ;;  %v1183_v32 = vshrl.u32 %v2496_v56, %v1177_v19  ;;  %v1186_v22 = vshrl.u32 %v2497_v60, %v1177_v19 }
 0x13f   : > { %v1038_v20 = vxor.u32 2147483648, %v1037_v4  ;;  %v1189_v42 = vshrl.u32 %v2498_v0, %v1177_v19  ;;  %v1062_v36 = vshrl.u32 %v1061_v39, 23  ;;  %v1185_v24 = vshll.u32 %v2496_v56, %v1176_v34 }
 0x140   : > { %v3194_v26 = vsub.s32 %v910_v52, %v913_v35  ;;  %v1181_v12 = vor.u32 %v1180_v41, %v1179_v33  ;;  %v1188_v21 = vshll.u32 %v2497_v60, %v1176_v34  ;;  %v1184_v9 = vor.u32 %v1183_v32, %v1182_v55 }
 0x141   : > { %v1039_v3 = vsel %vm956_vm11, %v1038_v20, %v1037_v4  ;;  %v1191_v14 = vshll.u32 %v2498_v0, %v1176_v34  ;;  %v1187_v28 = vor.u32 %v1186_v22, %v1185_v24  ;;  %v1192_v16 = vshrl.u32 %v2499_v13, %v1177_v19 }
 0x142   : > { %v1042_v27 = vsel %vm3144_vm13, %v2884_v15, %v1039_v3  ;;  %v916_v25 = vsub.s32 0, %v3194_v26  ;;  %v1190_v43 = vor.u32 %v1189_v42, %v1188_v21  ;;  %v3207_v52 = vand.u32 3, %v1047_v8 }
 0x143   : > { %2381 = vcosq.f32 %v1042_v27  ;;  %vm852_vm4 = vcmp.lt.s32.totalorder %v2895_v7, 0  ;;  %v1210_v29 = vshll.u32 %v1170_v31, 8  ;;  %v1178_v17 = vshrl.u32 %v2494_v44, %v1177_v19 }
 0x144   : > { %2383 = vsinq.f32 %v1042_v27  ;;  %v2199_v47 = vmin.u32 %v916_v25, %v3194_v26  ;;  %v1193_v10 = vor.u32 %v1192_v16, %v1191_v14  ;;  %vm1194_vm5 = vcmp.lt.s32.totalorder %v1175_v59, 1 }
 0x145   : > { %v2206_v40 = vadd.s32 4294967169, %v1062_v36  ;;  %vm1196_vm6 = vcmp.lt.s32.totalorder %v1175_v59, 3  ;;  %vm1197_vm7 = vcmp.lt.s32.totalorder %v1175_v59, 4  ;;  %v1202_v63 = vsel %vm1194_vm5, %v1181_v12, %v1184_v9 }
 0x146   : > { %v918_v30 = vclz %v2199_v47  ;;  %v1199_v45 = vsel %vm1197_vm7, %v1187_v28, 2102212464  ;;  %v1203_v34 = vsel %vm1197_vm7, %v1190_v43, 920167782  ;;  %v1206_v53 = vsel %vm1194_vm5, %v1184_v9, %v1187_v28 }
 0x147   : > { %v1207_v46 = vsel %vm1197_vm7, %v1193_v10, 1326507024  ;;  %vm1050_vm8 = vcmp.eq.s32.totalorder %v3207_v52, 0  ;;  %vm3217_vm11 = vcmp.le.f32.partialorder %v850_v37, 0.7853982  ;;  %vm1195_vm9 = vcmp.lt.s32.totalorder %v1175_v59, 2 }
 0x148   : > { %v2200_v18 = vadd.s32 4294967294, %v918_v30  ;;  %v1204_v19 = vsel %vm1196_vm6, %v1187_v28, %v1203_v34  ;;  %v1208_v39 = vsel %vm1196_vm6, %v1190_v43, %v1207_v46  ;;  %vm1049_vm12 = vcmp.lt.s32.totalorder %v3207_v52, 2 }
 0x149   : > { %v936_v4 = vsub.s32 4, %v3184_v23  ;;  %v1198_v8 = vsel %vm1194_vm5, %v1178_v17, %v1181_v12  ;;  %v1205_v35 = vsel %vm1195_vm9, %v1202_v63, %v1204_v19  ;;  %v1209_v31 = vsel %vm1195_vm9, %v1206_v53, %v1208_v39 }
 0x14a   : > { %vm2201_vm13 = vcmp.lt.s32.totalorder %v2200_v18, 0  ;;  %v1200_v37 = vsel %vm1196_vm6, %v1184_v9, %v1199_v45  ;;  %v3229_v33 = vmul.u32.u64.low %v1210_v29, %v1209_v31  ;;  %v3230_v41 = vmul.u32.u64.high %v1210_v29, %v1209_v31, %v3229_v33 }
 0x14b   : > { %v921_v20 = vsel %vm2201_vm13, 0, %v2200_v18  ;;  %v3232_v32 = vmul.u32.u64.low %v1210_v29, %v1205_v35  ;;  %v3233_v22 = vmul.u32.u64.high %v1210_v29, %v1205_v35, %v3232_v32  ;;  %v1068_v42 = vadd.s32 1, %v2206_v40 }
 0x14c   : > { %vm1053_vm10 = vcmp.eq.s32.totalorder %v3207_v52, 2  ;;  %v906_v55 = vadd.s32 %v3137_v11, %v3153_v51  ;;  %v922_v36 = vsub.s32 32, %v921_v20  ;;  %v926_v3 = vsub.s32 4294967266, %v921_v20 }
 0x14d   : > { %v2382_v12 = vpop.eup %2381  ;;  %v937_v24 = vsel %vm852_vm4, %v936_v4, %v3184_v23  ;;  %v1201_v21 = vsel %vm1195_vm9, %v1198_v8, %v1200_v37  ;;  %v1058_v27 = vand.u32 2147483647, %v3171_v38  ;;  %vm1069_vm14 = vcmp.gt.s32.totalorder %v1068_v42, 0 }
 0x14e   : > { %v2384_v25 = vpop.eup %2383  ;;  %v1054_v9 = vxor.u32 2147483648, %v2382_v12  ;;  %v923_v14 = vshll.u32 %v3194_v26, %v921_v20  ;;  %v924_v28 = vshrl.u32 %v906_v55, %v922_v36  ;;  %v927_v43 = vadd.s32 127, %v926_v3  ;;  %v386_v3 = vpop.permute.xlu1 %385 }
 0x14f   : > { %v1051_v16 = vxor.u32 2147483648, %v2384_v25  ;;  %vm1219_vm0 = vc.u32 %v3230_v41, %v3232_v32  ;;  %v1220_v11 = vadd.s32 1, %v3233_v22  ;;  %v1070_v51 = vsel %vm1069_vm14, %v1068_v42, 0 }
 0x150   : > { %v1055_v23 = vsel %vm1053_vm10, %v1054_v9, %v2384_v25  ;;  %v925_v59 = vor.u32 %v924_v28, %v923_v14  ;;  %v928_v47 = vshll.u32 %v927_v43, 23  ;;  %v1217_v17 = vmul.u32 %v1210_v29, %v1201_v21 }
 0x151   : > { %v1052_v10 = vsel %vm1050_vm8, %v2382_v12, %v1051_v16  ;;  %v939_v26 = vsel %vm3217_vm11, 0, %v937_v24  ;;  %v1221_v40 = vsel %vm1219_vm0, %v1220_v11, %v3233_v22  ;;  %v1072_v30 = vand.u32 31, %v1070_v51 }
 0x152   : > { %vm1046_vm15 = vweird.f32 %v2884_v15  ;;  %v1056_v63 = vsel %vm1049_vm12, %v1052_v10, %v1055_v23  ;;  %v929_v45 = vor.u32 4788187, %v928_v47  ;;  %v1222_v34 = vadd.s32 %v1221_v40, %v1217_v17 }
 0x153   : > { %v1057_v53 = vsel %vm1046_vm15, nan, %v1056_v63  ;;  %v1065_v29 = vand.u32 8388607, %v1058_v27  ;;  %v1073_v46 = vsub.s32 32, %v1072_v30  ;;  %v932_v19 = vcvt.s32.f32 %v925_v59 }
 0x154   : > { %2103 = vst [vmem:[%s2979_s30 + $0x28] sm:$0xff] %v1057_v53  ;;  %v930_v18 = vand.u32 2147483647, %v929_v45  ;;  %v943_v39 = vadd.s32 3, %v939_v26  ;;  %v1223_v4 = vadd.s32 536870912, %v1222_v34  ;;  %v1071_v8 = vshrl.u32 %v1070_v51, 5 }
 0x155   : > { %v1076_v35 = vshrl.u32 %v2495_v54, %v1073_v46  ;;  %v1079_v15 = vshrl.u32 %v2496_v56, %v1073_v46  ;;  %v1082_v52 = vshrl.u32 %v2497_v60, %v1073_v46  ;;  %v1075_v33 = vshll.u32 %v2494_v44, %v1072_v30 }
 0x156   : > { %v933_v31 = vmul.f32 %v932_v19, %v930_v18  ;;  %v1224_v37 = vshrl.u32 %v1223_v4, 30  ;;  %v1085_v20 = vshrl.u32 %v2498_v0, %v1073_v46  ;;  %v1078_v22 = vshll.u32 %v2495_v54, %v1072_v30 }
 0x157   : > { %v1081_v42 = vshll.u32 %v2496_v56, %v1072_v30  ;;  %v1084_v55 = vshll.u32 %v2497_v60, %v1072_v30  ;;  %v1088_v36 = vshrl.u32 %v2499_v13, %v1073_v46  ;;  %v3270_v24 = vand.u32 3, %v943_v39 }
 0x158   : > { %v934_v12 = vxor.u32 2147483648, %v933_v31  ;;  %v1225_v21 = vshll.u32 %v1224_v37, 30  ;;  %v1087_v25 = vshll.u32 %v2498_v0, %v1072_v30  ;;  %v1077_v9 = vor.u32 %v1076_v35, %v1075_v33 }
 0x159   : > { %v1080_v14 = vor.u32 %v1079_v15, %v1078_v22  ;;  %v1083_v28 = vor.u32 %v1082_v52, %v1081_v42  ;;  %v1086_v43 = vor.u32 %v1085_v20, %v1084_v55  ;;  %v1066_v51 = vor.u32 8388608, %v1065_v29  ;;  %v381_v15 = vpop.permute.xlu0 %380 }
 0x15a   : > { %v935_v16 = vsel %vm852_vm4, %v934_v12, %v933_v31  ;;  %v3275_v11 = vsub.s32 %v1222_v34, %v1225_v21  ;;  %v3278_v23 = vadd.f32 %v386_v3, %v2675_v57  ;;  %v1074_v47 = vshrl.u32 %v2494_v44, %v1073_v46 }
 0x15b   : > { %v938_v59 = vsel %vm3217_vm11, %v2895_v7, %v935_v16  ;;  %v1089_v17 = vor.u32 %v1088_v36, %v1087_v25  ;;  %vm1090_vm1 = vcmp.lt.s32.totalorder %v1071_v8, 1  ;;  %vm3286_vm2 = vcmp.le.f32.partialorder %v1162_v48, 0.7853982 }
 0x15c   : > { %2385 = vcosq.f32 %v938_v59  ;;  %v1228_v26 = vsub.s32 0, %v3275_v11  ;;  %vm1092_vm3 = vcmp.lt.s32.totalorder %v1071_v8, 3  ;;  %vm1093_vm4 = vcmp.lt.s32.totalorder %v1071_v8, 4 }
 0x15d   : > { %2387 = vsinq.f32 %v938_v59  ;;  %v1095_v57 = vsel %vm1093_vm4, %v1083_v28, 2102212464  ;;  %v1098_v49 = vsel %vm1090_vm1, %v1077_v9, %v1080_v14  ;;  %v1099_v40 = vsel %vm1093_vm4, %v1086_v43, 920167782 }
 0x15e   : > { %v2211_v30 = vmin.u32 %v1228_v26, %v3275_v11  ;;  %v1248_v63 = vsub.s32 4, %v1224_v37  ;;  %vm1091_vm5 = vcmp.lt.s32.totalorder %v1071_v8, 2  ;;  %v1100_v45 = vsel %vm1092_vm3, %v1083_v28, %v1099_v40 }
 0x15f   : > { %v1101_v48 = vsel %vm1091_vm5, %v1098_v49, %v1100_v45  ;;  %v1102_v34 = vsel %vm1090_vm1, %v1080_v14, %v1083_v28  ;;  %v1103_v53 = vsel %vm1093_vm4, %v1089_v17, 1326507024  ;;  %v1106_v29 = vshll.u32 %v1066_v51, 8 }
 0x160   : > { %vm1164_vm6 = vcmp.lt.s32.totalorder %v3113_v50, 0  ;;  %v1230_v46 = vclz %v2211_v30  ;;  %v1094_v18 = vsel %vm1090_vm1, %v1074_v47, %v1077_v9  ;;  %v1096_v19 = vsel %vm1092_vm3, %v1080_v14, %v1095_v57 }
 0x161   : > { %vm946_vm7 = vcmp.eq.s32.totalorder %v3270_v24, 0  ;;  %v1104_v39 = vsel %vm1092_vm3, %v1086_v43, %v1103_v53  ;;  %v3301_v4 = vmul.u32.u64.low %v1106_v29, %v1101_v48  ;;  %v3302_v35 = vmul.u32.u64.high %v1106_v29, %v1101_v48, %v3301_v4 }
 0x162   : > { %v2212_v52 = vadd.s32 4294967294, %v1230_v46  ;;  %v1249_v31 = vsel %vm1164_vm6, %v1248_v63, %v1224_v37  ;;  %v1105_v33 = vsel %vm1091_vm5, %v1102_v34, %v1104_v39  ;;  %v1373_v20 = vand.u32 2139095040, %v3278_v23 }
 0x163   : > { %vm942_vm8 = vweird.f32 %v2895_v7  ;;  %v1097_v22 = vsel %vm1091_vm5, %v1094_v18, %v1096_v19  ;;  %v3310_v42 = vmul.u32.u64.low %v1106_v29, %v1105_v33  ;;  %v3311_v55 = vmul.u32.u64.high %v1106_v29, %v1105_v33, %v3310_v42 }
 0x164   : > { %v1370_v36 = vand.u32 2147483647, %v3278_v23  ;;  %vm949_vm11 = vcmp.eq.s32.totalorder %v3270_v24, 2  ;;  %vm2213_vm9 = vcmp.lt.s32.totalorder %v2212_v52, 0  ;;  %v1374_v3 = vshrl.u32 %v1373_v20, 23 }
 0x165   : > { %v3316_v12 = vadd.f32 %v381_v15, %v2677_v58  ;;  %v1218_v37 = vadd.s32 %v3232_v32, %v3230_v41  ;;  %v1233_v21 = vsel %vm2213_vm9, 0, %v2212_v52  ;;  %v1251_v8 = vsel %vm3286_vm2, 0, %v1249_v31 }
 0x166   : > { %v1116_v25 = vadd.s32 1, %v3302_v35  ;;  %v2386_v9 = vpop.eup %2385  ;;  %v1234_v14 = vsub.s32 32, %v1233_v21  ;;  %v1238_v28 = vsub.s32 4294967266, %v1233_v21  ;;  %v1113_v43 = vmul.u32 %v1106_v29, %v1097_v22 }
 0x167   : > { %v2218_v16 = vadd.s32 4294967169, %v1374_v3  ;;  %v2388_v51 = vpop.eup %2387  ;;  %v950_v59 = vxor.u32 2147483648, %v2386_v9  ;;  %v1235_v47 = vshll.u32 %v3275_v11, %v1233_v21  ;;  %vm1115_vm12 = vc.u32 %v3311_v55, %v3301_v4 }
 0x168   : > { %v1377_v58 = vand.u32 8388607, %v1370_v36  ;;  %v947_v41 = vxor.u32 2147483648, %v2388_v51  ;;  %v1236_v32 = vshrl.u32 %v1218_v37, %v1234_v14  ;;  %v1239_v17 = vadd.s32 127, %v1238_v28 }
 0x169   : > { %v1117_v26 = vsel %vm1115_vm12, %v1116_v25, %v3302_v35  ;;  %v951_v57 = vsel %vm949_vm11, %v950_v59, %v2388_v51  ;;  %v1380_v40 = vadd.s32 1, %v2218_v16  ;;  %v1269_v30 = vand.u32 2139095040, %v3316_v12 }
 0x16a   : > { %v1118_v49 = vadd.s32 %v1117_v26, %v1113_v43  ;;  %vm945_vm13 = vcmp.lt.s32.totalorder %v3270_v24, 2  ;;  %v948_v11 = vsel %vm946_vm7, %v2386_v9, %v947_v41  ;;  %v1237_v63 = vor.u32 %v1236_v32, %v1235_v47 }
 0x16b   : > { %v1240_v45 = vshll.u32 %v1239_v17, 23  ;;  %v952_v48 = vsel %vm945_vm13, %v948_v11, %v951_v57  ;;  %v1255_v34 = vadd.s32 3, %v1251_v8  ;;  %vm1381_vm10 = vcmp.gt.s32.totalorder %v1380_v40, 0 }
 0x16c   : > { %v1119_v53 = vadd.s32 536870912, %v1118_v49  ;;  %v953_v29 = vsel %vm942_vm8, nan, %v952_v48  ;;  %v1378_v18 = vor.u32 8388608, %v1377_v58  ;;  %v1382_v19 = vsel %vm1381_vm10, %v1380_v40, 0 }
 0x16d   : > { %v1241_v46 = vor.u32 4788187, %v1240_v45  ;;  %2102 = vst [vmem:[%s2979_s30 + $0x20] sm:$0xff] %v953_v29  ;;  %v1384_v35 = vand.u32 31, %v1382_v19  ;;  %v1270_v15 = vshrl.u32 %v1269_v30, 23  ;;  %v1244_v31 = vcvt.s32.f32 %v1237_v63 }
 0x16e   : > { %v1120_v39 = vshrl.u32 %v1119_v53, 30  ;;  %v3337_v24 = vand.u32 3, %v1255_v34  ;;  %vm1060_vm14 = vcmp.lt.s32.totalorder %v3171_v38, 0  ;;  %v1114_v42 = vadd.s32 %v3301_v4, %v3311_v55 }
 0x16f   : > { %v1242_v52 = vand.u32 2147483647, %v1241_v46  ;;  %v1385_v20 = vsub.s32 32, %v1384_v35  ;;  %v3341_v7 = vshll.u32 %v1378_v18, 8  ;;  %v1266_v3 = vand.u32 2147483647, %v3316_v12 }
 0x170   : > { %v1121_v33 = vshll.u32 %v1120_v39, 30  ;;  %v3346_v21 = vshrl.u32 %v1382_v19, 5  ;;  %v2214_v25 = vadd.s32 4294967169, %v1270_v15  ;;  %v1387_v14 = vshll.u32 %v2494_v44, %v1384_v35 }
 0x171   : > { %v1245_v22 = vmul.f32 %v1244_v31, %v1242_v52  ;;  %v1388_v8 = vshrl.u32 %v2495_v54, %v1385_v20  ;;  %v1391_v28 = vshrl.u32 %v2496_v56, %v1385_v20  ;;  %v1394_v43 = vshrl.u32 %v2497_v60, %v1385_v20 }
 0x172   : > { %v3344_v37 = vsub.s32 %v1118_v49, %v1121_v33  ;;  %v1390_v55 = vshll.u32 %v2495_v54, %v1384_v35  ;;  %v1393_v16 = vshll.u32 %v2496_v56, %v1384_v35  ;;  %v1397_v51 = vshrl.u32 %v2498_v0, %v1385_v20 }
 0x173   : > { %v1246_v9 = vxor.u32 2147483648, %v1245_v22  ;;  %v1144_v47 = vsub.s32 4, %v1120_v39  ;;  %v1389_v58 = vor.u32 %v1388_v8, %v1387_v14  ;;  %v1396_v41 = vshll.u32 %v2497_v60, %v1384_v35 }
 0x174   : > { %v1124_v4 = vsub.s32 0, %v3344_v37  ;;  %v1392_v26 = vor.u32 %v1391_v28, %v1390_v55  ;;  %v1395_v57 = vor.u32 %v1394_v43, %v1393_v16  ;;  %v1399_v40 = vshll.u32 %v2498_v0, %v1384_v35 }
 0x175   : > { %v1247_v59 = vsel %vm1164_vm6, %v1246_v9, %v1245_v22  ;;  %v1398_v49 = vor.u32 %v1397_v51, %v1396_v41  ;;  %v1400_v30 = vshrl.u32 %v2499_v13, %v1385_v20  ;;  %v3367_v63 = vand.u32 8388607, %v1266_v3 }
 0x176   : > { %v1250_v32 = vsel %vm3286_vm2, %v3113_v50, %v1247_v59  ;;  %v2207_v17 = vmin.u32 %v1124_v4, %v3344_v37  ;;  %v1276_v45 = vadd.s32 1, %v2214_v25  ;;  %vm3371_vm0 = vcmp.le.f32.partialorder %v1058_v27, 0.7853982  ;;  %v396_v59 = vpop.permute.xlu1 %395 }
 0x177   : > { %2389 = vcosq.f32 %v1250_v32  ;;  %v1145_v48 = vsel %vm1060_vm14, %v1144_v47, %v1120_v39  ;;  %v1386_v34 = vshrl.u32 %v2494_v44, %v1385_v20  ;;  %v1401_v53 = vor.u32 %v1400_v30, %v1399_v40 }
 0x178   : > { %2391 = vsinq.f32 %v1250_v32  ;;  %v1126_v11 = vclz %v2207_v17  ;;  %vm1402_vm15 = vcmp.lt.s32.totalorder %v3346_v21, 1  ;;  %vm1404_vm1 = vcmp.lt.s32.totalorder %v3346_v21, 3 }
 0x179   : > { %vm1405_vm2 = vcmp.lt.s32.totalorder %v3346_v21, 4  ;;  %v1410_v46 = vsel %vm1402_vm15, %v1389_v58, %v1392_v26  ;;  %v1414_v19 = vsel %vm1402_vm15, %v1392_v26, %v1395_v57  ;;  %vm1258_vm3 = vcmp.eq.s32.totalorder %v3337_v24, 0 }
 0x17a   : > { %v2208_v29 = vadd.s32 4294967294, %v1126_v11  ;;  %v1407_v27 = vsel %vm1405_vm2, %v1395_v57, 2102212464  ;;  %v1411_v18 = vsel %vm1405_vm2, %v1398_v49, 920167782  ;;  %vm1403_vm5 = vcmp.lt.s32.totalorder %v3346_v21, 2 }
 0x17b   : > { %v1415_v35 = vsel %vm1405_vm2, %v1401_v53, 1326507024  ;;  %v1412_v39 = vsel %vm1404_vm1, %v1395_v57, %v1411_v18  ;;  %vm1257_vm6 = vcmp.lt.s32.totalorder %v3337_v24, 2  ;;  %v1406_v31 = vsel %vm1402_vm15, %v1386_v34, %v1389_v58 }
 0x17c   : > { %vm2209_vm4 = vcmp.lt.s32.totalorder %v2208_v29, 0  ;;  %v1416_v15 = vsel %vm1404_vm1, %v1398_v49, %v1415_v35  ;;  %v1413_v33 = vsel %vm1403_vm5, %v1410_v46, %v1412_v39  ;;  %vm1254_vm7 = vweird.f32 %v3113_v50 }
 0x17d   : > { %v1129_v52 = vsel %vm2209_vm4, 0, %v2208_v29  ;;  %v1417_v20 = vsel %vm1403_vm5, %v1414_v19, %v1416_v15  ;;  %v1408_v25 = vsel %vm1404_vm1, %v1392_v26, %v1407_v27  ;;  %vm1277_vm8 = vcmp.gt.s32.totalorder %v1276_v45, 0 }
 0x17e   : > { %v1130_v22 = vsub.s32 32, %v1129_v52  ;;  %v1134_v8 = vsub.s32 4294967266, %v1129_v52  ;;  %v3402_v9 = vmul.u32.u64.low %v3341_v7, %v1417_v20  ;;  %v3403_v14 = vmul.u32.u64.high %v3341_v7, %v1417_v20, %v3402_v9 }
 0x17f   : > { %v3406_v28 = vmul.u32.u64.low %v3341_v7, %v1413_v33  ;;  %v3407_v43 = vmul.u32.u64.high %v3341_v7, %v1413_v33, %v3406_v28  ;;  %v1131_v4 = vshll.u32 %v3344_v37, %v1129_v52  ;;  %v1278_v51 = vsel %vm1277_vm8, %v1276_v45, 0 }
 0x180   : > { %v1132_v55 = vshrl.u32 %v1114_v42, %v1130_v22  ;;  %v1135_v16 = vadd.s32 127, %v1134_v8  ;;  %vm1261_vm11 = vcmp.eq.s32.totalorder %v3337_v24, 2  ;;  %v1409_v58 = vsel %vm1403_vm5, %v1406_v31, %v1408_v25 }
 0x181   : > { %v2390_v47 = vpop.eup %2389  ;;  %v1274_v41 = vor.u32 8388608, %v3367_v63  ;;  %v1280_v32 = vand.u32 31, %v1278_v51  ;;  %v1147_v37 = vsel %vm3371_vm0, 0, %v1145_v48  ;;  %vm1427_vm9 = vc.u32 %v3403_v14, %v3406_v28 }
 0x182   : > { %v2392_v17 = vpop.eup %2391  ;;  %v1262_v26 = vxor.u32 2147483648, %v2390_v47  ;;  %v1133_v57 = vor.u32 %v1132_v55, %v1131_v4  ;;  %v1136_v49 = vshll.u32 %v1135_v16, 23  ;;  %v1428_v40 = vadd.s32 1, %v3407_v43 }
 0x183   : > { %v1259_v42 = vxor.u32 2147483648, %v2392_v17  ;;  %v3421_v30 = vadd.f32 %v396_v59, %v2679_v61  ;;  %v1425_v63 = vmul.u32 %v3341_v7, %v1409_v58  ;;  %v1281_v45 = vsub.s32 32, %v1280_v32 }
 0x184   : > { %v1263_v21 = vsel %vm1261_vm11, %v1262_v26, %v2392_v17  ;;  %v1137_v11 = vor.u32 4788187, %v1136_v49  ;;  %v1151_v53 = vadd.s32 3, %v1147_v37  ;;  %v1429_v48 = vsel %vm1427_vm9, %v1428_v40, %v3407_v43 }
 0x185   : > { %v1260_v34 = vsel %vm1258_vm3, %v2390_v47, %v1259_v42  ;;  %v3427_v29 = vshrl.u32 %v1278_v51, 5  ;;  %v1140_v61 = vcvt.s32.f32 %v1133_v57  ;;  %v1430_v18 = vadd.s32 %v1429_v48, %v1425_v63 }
 0x186   : > { %v1264_v46 = vsel %vm1257_vm6, %v1260_v34, %v1263_v21  ;;  %v1138_v27 = vand.u32 2147483647, %v1137_v11  ;;  %v1283_v7 = vshll.u32 %v2494_v44, %v1280_v32  ;;  %v1284_v35 = vshrl.u32 %v2495_v54, %v1281_v45 }
 0x187   : > { %v1265_v19 = vsel %vm1254_vm7, nan, %v1264_v46  ;;  %v1287_v39 = vshrl.u32 %v2496_v56, %v1281_v45  ;;  %v1431_v52 = vadd.s32 536870912, %v1430_v18  ;;  %v1286_v31 = vshll.u32 %v2495_v54, %v1280_v32 }
 0x188   : > { %2105 = vst [vmem:[%s2979_s30 + $0x38] sm:$0xff] %v1265_v19  ;;  %v1141_v15 = vmul.f32 %v1140_v61, %v1138_v27  ;;  %v1290_v24 = vshrl.u32 %v2497_v60, %v1281_v45  ;;  %v1285_v33 = vor.u32 %v1284_v35, %v1283_v7  ;;  %v1289_v20 = vshll.u32 %v2496_v56, %v1280_v32 }
 0x189   : > { %v1292_v22 = vshll.u32 %v2497_v60, %v1280_v32  ;;  %v1293_v50 = vshrl.u32 %v2498_v0, %v1281_v45  ;;  %v1432_v25 = vshrl.u32 %v1431_v52, 30  ;;  %v1288_v9 = vor.u32 %v1287_v39, %v1286_v31 }
 0x18a   : > { %v1142_v8 = vxor.u32 2147483648, %v1141_v15  ;;  %v1296_v43 = vshrl.u32 %v2499_v13, %v1281_v45  ;;  %v1291_v4 = vor.u32 %v1290_v24, %v1289_v20  ;;  %v1295_v16 = vshll.u32 %v2498_v0, %v1280_v32 }
 0x18b   : > { %v1294_v55 = vor.u32 %v1293_v50, %v1292_v22  ;;  %v3446_v59 = vand.u32 3, %v1151_v53  ;;  %v1433_v47 = vshll.u32 %v1432_v25, 30  ;;  %v3448_v58 = vshll.u32 %v1274_v41, 8  ;;  %v391_v50 = vpop.permute.xlu0 %390 }
 0x18c   : > { %v1143_v51 = vsel %vm1060_vm14, %v1142_v8, %v1141_v15  ;;  %v1297_v26 = vor.u32 %v1296_v43, %v1295_v16  ;;  %vm1298_vm12 = vcmp.lt.s32.totalorder %v3427_v29, 1  ;;  %v1581_v57 = vand.u32 2139095040, %v3421_v30 }
 0x18d   : > { %v1146_v17 = vsel %vm3371_vm0, %v3171_v38, %v1143_v51  ;;  %v3455_v49 = vsub.s32 %v1430_v18, %v1433_v47  ;;  %vm1301_vm13 = vcmp.lt.s32.totalorder %v3427_v29, 4  ;;  %v1306_v32 = vsel %vm1298_vm12, %v1285_v33, %v1288_v9 }
 0x18e   : > { %2393 = vcosq.f32 %v1146_v17  ;;  %vm1300_vm10 = vcmp.lt.s32.totalorder %v3427_v29, 3  ;;  %v1303_v41 = vsel %vm1301_vm13, %v1291_v4, 2102212464  ;;  %v1307_v37 = vsel %vm1301_vm13, %v1294_v55, 920167782 }
 0x18f   : > { %2395 = vsinq.f32 %v1146_v17  ;;  %v1436_v10 = vsub.s32 0, %v3455_v49  ;;  %v1282_v42 = vshrl.u32 %v2494_v44, %v1281_v45  ;;  %vm1299_vm14 = vcmp.lt.s32.totalorder %v3427_v29, 2 }
 0x190   : > { %v1308_v40 = vsel %vm1300_vm10, %v1291_v4, %v1307_v37  ;;  %v1456_v21 = vsub.s32 4, %v1432_v25  ;;  %v1310_v63 = vsel %vm1298_vm12, %v1288_v9, %v1291_v4  ;;  %v1311_v34 = vsel %vm1301_vm13, %v1297_v26, 1326507024 }
 0x191   : > { %v1309_v11 = vsel %vm1299_vm14, %v1306_v32, %v1308_v40  ;;  %v2219_v53 = vmin.u32 %v1436_v10, %v3455_v49  ;;  %v1302_v48 = vsel %vm1298_vm12, %v1282_v42, %v1285_v33  ;;  %v1304_v46 = vsel %vm1300_vm10, %v1288_v9, %v1303_v41 }
 0x192   : > { %v1312_v27 = vsel %vm1300_vm10, %v1294_v55, %v1311_v34  ;;  %v3474_v61 = vmul.u32.u64.low %v3448_v58, %v1309_v11  ;;  %v3475_v18 = vmul.u32.u64.high %v3448_v58, %v1309_v11, %v3474_v61  ;;  %v1582_v19 = vshrl.u32 %v1581_v57, 23 }
 0x193   : > { %v1313_v45 = vsel %vm1299_vm14, %v1310_v63, %v1312_v27  ;;  %vm1372_vm0 = vcmp.lt.s32.totalorder %v3278_v23, 0  ;;  %v1438_v7 = vclz %v2219_v53  ;;  %vm1150_vm15 = vweird.f32 %v3171_v38 }
 0x194   : > { %v1457_v35 = vsel %vm1372_vm0, %v1456_v21, %v1432_v25  ;;  %v3482_v39 = vmul.u32.u64.low %v3448_v58, %v1313_v45  ;;  %v3483_v15 = vmul.u32.u64.high %v3448_v58, %v1313_v45, %v3482_v39  ;;  %v2226_v52 = vadd.s32 4294967169, %v1582_v19 }
 0x195   : > { %vm1153_vm1 = vcmp.lt.s32.totalorder %v3446_v59, 2  ;;  %vm3488_vm2 = vcmp.le.f32.partialorder %v1370_v36, 0.7853982  ;;  %v2220_v24 = vadd.s32 4294967294, %v1438_v7  ;;  %v1305_v33 = vsel %vm1299_vm14, %v1302_v48, %v1304_v46 }
 0x196   : > { %vm1154_vm3 = vcmp.eq.s32.totalorder %v3446_v59, 0  ;;  %vm1157_vm4 = vcmp.eq.s32.totalorder %v3446_v59, 2  ;;  %v1324_v20 = vadd.s32 1, %v3475_v18  ;;  %v1588_v22 = vadd.s32 1, %v2226_v52 }
 0x197   : > { %v1426_v25 = vadd.s32 %v3406_v28, %v3403_v14  ;;  %vm2221_vm5 = vcmp.lt.s32.totalorder %v2220_v24, 0  ;;  %v1459_v36 = vsel %vm3488_vm2, 0, %v1457_v35  ;;  %v1578_v9 = vand.u32 2147483647, %v3421_v30 }
 0x198   : > { %v2394_v8 = vpop.eup %2393  ;;  %v1441_v4 = vsel %vm2221_vm5, 0, %v2220_v24  ;;  %v1321_v55 = vmul.u32 %v3448_v58, %v1305_v33  ;;  %vm1323_vm6 = vc.u32 %v3483_v15, %v3474_v61  ;;  %v3505_v17 = vadd.f32 %v391_v50, %v2681_v62 }
 0x199   : > { %v2396_v29 = vpop.eup %2395  ;;  %v1158_v43 = vxor.u32 2147483648, %v2394_v8  ;;  %v1442_v51 = vsub.s32 32, %v1441_v4  ;;  %v1446_v47 = vsub.s32 4294967266, %v1441_v4  ;;  %v1443_v28 = vshll.u32 %v3455_v49, %v1441_v4 }
 0x19a   : > { %v1155_v16 = vxor.u32 2147483648, %v2396_v29  ;;  %v1325_v26 = vsel %vm1323_vm6, %v1324_v20, %v3475_v18  ;;  %vm1589_vm7 = vcmp.gt.s32.totalorder %v1588_v22, 0  ;;  %v1463_v62 = vadd.s32 3, %v1459_v36 }
 0x19b   : > { %v1159_v14 = vsel %vm1157_vm4, %v1158_v43, %v2396_v29  ;;  %v1444_v57 = vshrl.u32 %v1426_v25, %v1442_v51  ;;  %v1447_v32 = vadd.s32 127, %v1446_v47  ;;  %v1326_v41 = vadd.s32 %v1325_v26, %v1321_v55 }
 0x19c   : > { %v1156_v58 = vsel %vm1154_vm3, %v2394_v8, %v1155_v16  ;;  %v1585_v10 = vand.u32 8388607, %v1578_v9  ;;  %v1590_v42 = vsel %vm1589_vm7, %v1588_v22, 0  ;;  %v1477_v34 = vand.u32 2139095040, %v3505_v17 }
 0x19d   : > { %v1160_v37 = vsel %vm1153_vm1, %v1156_v58, %v1159_v14  ;;  %v1445_v40 = vor.u32 %v1444_v57, %v1443_v28  ;;  %v1448_v21 = vshll.u32 %v1447_v32, 23  ;;  %v1327_v11 = vadd.s32 536870912, %v1326_v41 }
 0x19e   : > { %v1161_v49 = vsel %vm1150_vm15, nan, %v1160_v37  ;;  %v1592_v63 = vand.u32 31, %v1590_v42  ;;  %v3521_v46 = vand.u32 3, %v1463_v62  ;;  %v1586_v59 = vor.u32 8388608, %v1585_v10 }
 0x19f   : > { %2104 = vst [vmem:[%s2979_s30 + $0x30] sm:$0xff] %v1161_v49  ;;  %v1449_v53 = vor.u32 4788187, %v1448_v21  ;;  %v1328_v48 = vshrl.u32 %v1327_v11, 30  ;;  %v1474_v45 = vand.u32 2147483647, %v3505_v17  ;;  %v1452_v19 = vcvt.s32.f32 %v1445_v40 }
 0x1a0   : > { %v1593_v27 = vsub.s32 32, %v1592_v63  ;;  %vm1268_vm8 = vcmp.lt.s32.totalorder %v3316_v12, 0  ;;  %v3526_v38 = vadd.s32 %v3474_v61, %v3483_v15  ;;  %v1478_v24 = vshrl.u32 %v1477_v34, 23 }
 0x1a1   : > { %v1450_v18 = vand.u32 2147483647, %v1449_v53  ;;  %v1329_v7 = vshll.u32 %v1328_v48, 30  ;;  %v1595_v22 = vshll.u32 %v2494_v44, %v1592_v63  ;;  %v1352_v8 = vsub.s32 4, %v1328_v48 }
 0x1a2   : > { %v1596_v35 = vshrl.u32 %v2495_v54, %v1593_v27  ;;  %v1599_v39 = vshrl.u32 %v2496_v56, %v1593_v27  ;;  %v1602_v52 = vshrl.u32 %v2497_v60, %v1593_v27  ;;  %v1605_v50 = vshrl.u32 %v2498_v0, %v1593_v27 }
 0x1a3   : > { %v1453_v33 = vmul.f32 %v1452_v19, %v1450_v18  ;;  %v3531_v20 = vsub.s32 %v1326_v41, %v1329_v7  ;;  %v1591_v25 = vshrl.u32 %v1590_v42, 5  ;;  %v1598_v61 = vshll.u32 %v2495_v54, %v1592_v63 }
 0x1a4   : > { %v1601_v15 = vshll.u32 %v2496_v56, %v1592_v63  ;;  %v1597_v43 = vor.u32 %v1596_v35, %v1595_v22  ;;  %v1604_v4 = vshll.u32 %v2497_v60, %v1592_v63  ;;  %vm3541_vm11 = vcmp.le.f32.partialorder %v1266_v3, 0.7853982 }
 0x1a5   : > { %v1454_v36 = vxor.u32 2147483648, %v1453_v33  ;;  %v1332_v29 = vsub.s32 0, %v3531_v20  ;;  %v1600_v16 = vor.u32 %v1599_v39, %v1598_v61  ;;  %v1607_v47 = vshll.u32 %v2498_v0, %v1592_v63 }
 0x1a6   : > { %v1603_v51 = vor.u32 %v1602_v52, %v1601_v15  ;;  %v1608_v14 = vshrl.u32 %v2499_v13, %v1593_v27  ;;  %v1606_v58 = vor.u32 %v1605_v50, %v1604_v4  ;;  %v3550_v57 = vshll.u32 %v1586_v59, 8 }
 0x1a7   : > { %v1455_v28 = vsel %vm1372_vm0, %v1454_v36, %v1453_v33  ;;  %v2215_v26 = vmin.u32 %v1332_v29, %v3531_v20  ;;  %v1594_v32 = vshrl.u32 %v2494_v44, %v1593_v27  ;;  %v2222_v37 = vadd.s32 4294967169, %v1478_v24  ;;  %v406_v36 = vpop.permute.xlu1 %405 }
 0x1a8   : > { %v1458_v3 = vsel %vm3488_vm2, %v3278_v23, %v1455_v28  ;;  %v1609_v41 = vor.u32 %v1608_v14, %v1607_v47  ;;  %vm1610_vm9 = vcmp.lt.s32.totalorder %v1591_v25, 1  ;;  %vm1613_vm12 = vcmp.lt.s32.totalorder %v1591_v25, 4 }
 0x1a9   : > { %2397 = vcosq.f32 %v1458_v3  ;;  %v1334_v62 = vclz %v2215_v26  ;;  %v1353_v10 = vsel %vm1268_vm8, %v1352_v8, %v1328_v48  ;;  %v1615_v42 = vsel %vm1613_vm12, %v1603_v51, 2102212464 }
 0x1aa   : > { %2399 = vsinq.f32 %v1458_v3  ;;  %v1618_v49 = vsel %vm1610_vm9, %v1597_v43, %v1600_v16  ;;  %vm1612_vm13 = vcmp.lt.s32.totalorder %v1591_v25, 3  ;;  %v1619_v21 = vsel %vm1613_vm12, %v1606_v58, 920167782 }
 0x1ab   : > { %v2216_v40 = vadd.s32 4294967294, %v1334_v62  ;;  %v1622_v11 = vsel %vm1610_vm9, %v1600_v16, %v1603_v51  ;;  %vm1611_vm10 = vcmp.lt.s32.totalorder %v1591_v25, 2  ;;  %v1614_v31 = vsel %vm1610_vm9, %v1594_v32, %v1597_v43 }
 0x1ac   : > { %v1620_v63 = vsel %vm1612_vm13, %v1603_v51, %v1619_v21  ;;  %v1623_v34 = vsel %vm1613_vm12, %v1609_v41, 1326507024  ;;  %v1616_v53 = vsel %vm1612_vm13, %v1600_v16, %v1615_v42  ;;  %v1355_v52 = vsel %vm3541_vm11, 0, %v1353_v10 }
 0x1ad   : > { %vm2217_vm14 = vcmp.lt.s32.totalorder %v2216_v40, 0  ;;  %v1621_v59 = vsel %vm1611_vm10, %v1618_v49, %v1620_v63  ;;  %v1624_v27 = vsel %vm1612_vm13, %v1606_v58, %v1623_v34  ;;  %v1484_v24 = vadd.s32 1, %v2222_v37 }
 0x1ae   : > { %v1337_v18 = vsel %vm2217_vm14, 0, %v2216_v40  ;;  %v1625_v19 = vsel %vm1611_vm10, %v1622_v11, %v1624_v27  ;;  %v3561_v48 = vmul.u32.u64.low %v3550_v57, %v1621_v59  ;;  %v3562_v7 = vmul.u32.u64.high %v3550_v57, %v1621_v59, %v3561_v48 }
 0x1af   : > { %v1338_v35 = vsub.s32 32, %v1337_v18  ;;  %v1342_v39 = vsub.s32 4294967266, %v1337_v18  ;;  %vm1462_vm0 = vweird.f32 %v3278_v23  ;;  %vm1465_vm15 = vcmp.lt.s32.totalorder %v3521_v46, 2 }
 0x1b0   : > { %v1617_v33 = vsel %vm1611_vm10, %v1614_v31, %v1616_v53  ;;  %v3571_v22 = vmul.u32.u64.low %v3550_v57, %v1625_v19  ;;  %v3572_v50 = vmul.u32.u64.high %v3550_v57, %v1625_v19, %v3571_v22  ;;  %v1339_v8 = vshll.u32 %v3531_v20, %v1337_v18 }
 0x1b1   : > { %v1340_v61 = vshrl.u32 %v3526_v38, %v1338_v35  ;;  %v1343_v15 = vadd.s32 127, %v1342_v39  ;;  %vm1485_vm1 = vcmp.gt.s32.totalorder %v1484_v24, 0  ;;  %vm1466_vm2 = vcmp.eq.s32.totalorder %v3521_v46, 0 }
 0x1b2   : > { %v1359_v29 = vadd.s32 3, %v1355_v52  ;;  %v1636_v43 = vadd.s32 1, %v3562_v7  ;;  %v1486_v4 = vsel %vm1485_vm1, %v1484_v24, 0  ;;  %v1481_v47 = vand.u32 8388607, %v1474_v45 }
 0x1b3   : > { %v2398_v16 = vpop.eup %2397  ;;  %v1341_v25 = vor.u32 %v1340_v61, %v1339_v8  ;;  %v1344_v51 = vshll.u32 %v1343_v15, 23  ;;  %v1488_v14 = vand.u32 31, %v1486_v4  ;;  %v1633_v38 = vmul.u32 %v3550_v57, %v1617_v33 }
 0x1b4   : > { %v2400_v28 = vpop.eup %2399  ;;  %v1470_v20 = vxor.u32 2147483648, %v2398_v16  ;;  %vm1635_vm3 = vc.u32 %v3572_v50, %v3561_v48  ;;  %v3584_v26 = vadd.f32 %v406_v36, %v2683_v1  ;;  %vm1469_vm4 = vcmp.eq.s32.totalorder %v3521_v46, 2 }
 0x1b5   : > { %v1467_v58 = vxor.u32 2147483648, %v2400_v28  ;;  %v1345_v3 = vor.u32 4788187, %v1344_v51  ;;  %v1637_v32 = vsel %vm1635_vm3, %v1636_v43, %v3562_v7  ;;  %v3588_v37 = vand.u32 3, %v1359_v29 }
 0x1b6   : > { %v1471_v41 = vsel %vm1469_vm4, %v1470_v20, %v2400_v28  ;;  %v1638_v62 = vadd.s32 %v1637_v32, %v1633_v38  ;;  %v1489_v10 = vsub.s32 32, %v1488_v14  ;;  %v1348_v49 = vcvt.s32.f32 %v1341_v25 }
 0x1b7   : > { %v1468_v57 = vsel %vm1466_vm2, %v2398_v16, %v1467_v58  ;;  %v1346_v42 = vand.u32 2147483647, %v1345_v3  ;;  %v1482_v40 = vor.u32 8388608, %v1481_v47  ;;  %v1789_v31 = vand.u32 2139095040, %v3584_v26 }
 0x1b8   : > { %v1472_v1 = vsel %vm1465_vm15, %v1468_v57, %v1471_v41  ;;  %v1639_v21 = vadd.s32 536870912, %v1638_v62  ;;  %v1492_v11 = vshrl.u32 %v2495_v54, %v1489_v10  ;;  %v1495_v53 = vshrl.u32 %v2496_v56, %v1489_v10 }
 0x1b9   : > { %v1473_v63 = vsel %vm1462_vm0, nan, %v1472_v1  ;;  %v1349_v34 = vmul.f32 %v1348_v49, %v1346_v42  ;;  %v1498_v59 = vshrl.u32 %v2497_v60, %v1489_v10  ;;  %v1491_v18 = vshll.u32 %v2494_v44, %v1488_v14 }
 0x1ba   : > { %2107 = vst [vmem:[%s2979_s30 + $0x48] sm:$0xff] %v1473_v63  ;;  %v3601_v27 = vshrl.u32 %v1639_v21, 30  ;;  %v1497_v46 = vshll.u32 %v2496_v56, %v1488_v14  ;;  %v1501_v19 = vshrl.u32 %v2498_v0, %v1489_v10  ;;  %v1487_v35 = vshrl.u32 %v1486_v4, 5 }
 0x1bb   : > { %v1350_v7 = vxor.u32 2147483648, %v1349_v34  ;;  %v1494_v39 = vshll.u32 %v2495_v54, %v1488_v14  ;;  %v1500_v23 = vshll.u32 %v2497_v60, %v1488_v14  ;;  %v1493_v24 = vor.u32 %v1492_v11, %v1491_v18 }
 0x1bc   : > { %v1641_v52 = vshll.u32 %v3601_v27, 30  ;;  %v1499_v33 = vor.u32 %v1498_v59, %v1497_v46  ;;  %v1504_v22 = vshrl.u32 %v2499_v13, %v1489_v10  ;;  %v1503_v36 = vshll.u32 %v2498_v0, %v1488_v14 }
 0x1bd   : > { %v1351_v8 = vsel %vm1268_vm8, %v1350_v7, %v1349_v34  ;;  %v1496_v61 = vor.u32 %v1495_v53, %v1494_v39  ;;  %v1502_v15 = vor.u32 %v1501_v19, %v1500_v23  ;;  %v3618_v4 = vshll.u32 %v1482_v40, 8 }
 0x1be   : > { %v1354_v29 = vsel %vm3541_vm11, %v3316_v12, %v1351_v8  ;;  %v3616_v43 = vsub.s32 %v1638_v62, %v1641_v52  ;;  %v1790_v16 = vshrl.u32 %v1789_v31, 23  ;;  %v1490_v25 = vshrl.u32 %v2494_v44, %v1489_v10 }
 0x1bf   : > { %2401 = vcosq.f32 %v1354_v29  ;;  %v1505_v51 = vor.u32 %v1504_v22, %v1503_v36  ;;  %vm1509_vm5 = vcmp.lt.s32.totalorder %v1487_v35, 4  ;;  %vm1506_vm6 = vcmp.lt.s32.totalorder %v1487_v35, 1 }
 0x1c0   : > { %2403 = vsinq.f32 %v1354_v29  ;;  %v1644_v47 = vsub.s32 0, %v3616_v43  ;;  %v1511_v28 = vsel %vm1509_vm5, %v1499_v33, 2102212464  ;;  %vm1507_vm7 = vcmp.lt.s32.totalorder %v1487_v35, 2 }
 0x1c1   : > { %vm1508_vm8 = vcmp.lt.s32.totalorder %v1487_v35, 3  ;;  %v1514_v14 = vsel %vm1506_vm6, %v1493_v24, %v1496_v61  ;;  %v1515_v55 = vsel %vm1509_vm5, %v1502_v15, 920167782  ;;  %v1510_v38 = vsel %vm1506_vm6, %v1490_v25, %v1493_v24 }
 0x1c2   : > { %v2227_v20 = vmin.u32 %v1644_v47, %v3616_v43  ;;  %v1512_v58 = vsel %vm1508_vm8, %v1496_v61, %v1511_v28  ;;  %v1516_v3 = vsel %vm1508_vm8, %v1499_v33, %v1515_v55  ;;  %v1518_v41 = vsel %vm1506_vm6, %v1496_v61, %v1499_v33  ;;  %v401_v61 = vpop.permute.xlu0 %400 }
 0x1c3   : > { %v1517_v32 = vsel %vm1507_vm7, %v1514_v14, %v1516_v3  ;;  %v1519_v62 = vsel %vm1509_vm5, %v1505_v51, 1326507024  ;;  %v2234_v10 = vadd.s32 4294967169, %v1790_v16  ;;  %vm1358_vm11 = vweird.f32 %v3316_v12 }
 0x1c4   : > { %v1646_v57 = vclz %v2227_v20  ;;  %v1520_v42 = vsel %vm1508_vm8, %v1502_v15, %v1519_v62  ;;  %v3625_v49 = vmul.u32.u64.low %v3618_v4, %v1517_v32  ;;  %v3626_v40 = vmul.u32.u64.high %v3618_v4, %v1517_v32, %v3625_v49 }
 0x1c5   : > { %vm1580_vm9 = vcmp.lt.s32.totalorder %v3421_v30, 0  ;;  %v1513_v21 = vsel %vm1507_vm7, %v1510_v38, %v1512_v58  ;;  %v1521_v11 = vsel %vm1507_vm7, %v1518_v41, %v1520_v42  ;;  %v1796_v31 = vadd.s32 1, %v2234_v10 }
 0x1c6   : > { %v2228_v1 = vadd.s32 4294967294, %v1646_v57  ;;  %vm1362_vm12 = vcmp.eq.s32.totalorder %v3588_v37, 0  ;;  %v3635_v63 = vmul.u32.u64.low %v3618_v4, %v1521_v11  ;;  %v3636_v34 = vmul.u32.u64.high %v3618_v4, %v1521_v11, %v3635_v63 }
 0x1c7   : > { %v1786_v53 = vand.u32 2147483647, %v3584_v26  ;;  %vm1365_vm13 = vcmp.eq.s32.totalorder %v3588_v37, 2  ;;  %v1634_v59 = vadd.s32 %v3561_v48, %v3572_v50  ;;  %vm1797_vm14 = vcmp.gt.s32.totalorder %v1796_v31, 0 }
 0x1c8   : > { %vm2229_vm10 = vcmp.lt.s32.totalorder %v2228_v1, 0  ;;  %v1664_v19 = vsub.s32 4, %v3601_v27  ;;  %v1529_v7 = vmul.u32 %v3618_v4, %v1513_v21  ;;  %v1532_v35 = vadd.s32 1, %v3626_v40 }
 0x1c9   : > { %v2402_v18 = vpop.eup %2401  ;;  %v1649_v46 = vsel %vm2229_vm10, 0, %v2228_v1  ;;  %vm3647_vm0 = vcmp.le.f32.partialorder %v1578_v9, 0.7853982  ;;  %v1798_v50 = vsel %vm1797_vm14, %v1796_v31, 0  ;;  %vm1531_vm15 = vc.u32 %v3636_v34, %v3625_v49 }
 0x1ca   : > { %v2404_v39 = vpop.eup %2403  ;;  %v1366_v23 = vxor.u32 2147483648, %v2402_v18  ;;  %v1650_v24 = vsub.s32 32, %v1649_v46  ;;  %v1654_v48 = vsub.s32 4294967266, %v1649_v46  ;;  %v1651_v22 = vshll.u32 %v3616_v43, %v1649_v46 }
 0x1cb   : > { %v1363_v33 = vxor.u32 2147483648, %v2404_v39  ;;  %v1793_v8 = vand.u32 8388607, %v1786_v53  ;;  %v1533_v29 = vsel %vm1531_vm15, %v1532_v35, %v3626_v40  ;;  %vm1361_vm1 = vcmp.lt.s32.totalorder %v3588_v37, 2 }
 0x1cc   : > { %v1367_v15 = vsel %vm1365_vm13, %v1366_v23, %v2404_v39  ;;  %v1652_v9 = vshrl.u32 %v1634_v59, %v1650_v24  ;;  %v1655_v36 = vadd.s32 127, %v1654_v48  ;;  %v1534_v4 = vadd.s32 %v1533_v29, %v1529_v7 }
 0x1cd   : > { %v1364_v43 = vsel %vm1362_vm12, %v2402_v18, %v1363_v33  ;;  %v1800_v16 = vand.u32 31, %v1798_v50  ;;  %v3663_v28 = vadd.f32 %v401_v61, %v2685_v2  ;;  %v1665_v55 = vsel %vm1580_vm9, %v1664_v19, %v3601_v27 }
 0x1ce   : > { %v1368_v25 = vsel %vm1361_vm1, %v1364_v43, %v1367_v15  ;;  %v1653_v51 = vor.u32 %v1652_v9, %v1651_v22  ;;  %v1656_v47 = vshll.u32 %v1655_v36, 23  ;;  %v1535_v20 = vadd.s32 536870912, %v1534_v4 }
 0x1cf   : > { %v1369_v14 = vsel %vm1358_vm11, nan, %v1368_v25  ;;  %v1801_v38 = vsub.s32 32, %v1800_v16  ;;  %v1794_v3 = vor.u32 8388608, %v1793_v8  ;;  %v1803_v32 = vshll.u32 %v2494_v44, %v1800_v16 }
 0x1d0   : > { %2106 = vst [vmem:[%s2979_s30 + $0x40] sm:$0xff] %v1369_v14  ;;  %v1657_v37 = vor.u32 4788187, %v1656_v47  ;;  %v1660_v58 = vcvt.s32.f32 %v1653_v51  ;;  %v1536_v41 = vshrl.u32 %v1535_v20, 30  ;;  %v1806_v2 = vshll.u32 %v2495_v54, %v1800_v16 }
 0x1d1   : > { %v1804_v62 = vshrl.u32 %v2495_v54, %v1801_v38  ;;  %v1807_v12 = vshrl.u32 %v2496_v56, %v1801_v38  ;;  %v1810_v57 = vshrl.u32 %v2497_v60, %v1801_v38  ;;  %v1812_v27 = vshll.u32 %v2497_v60, %v1800_v16 }
 0x1d2   : > { %v1658_v10 = vand.u32 2147483647, %v1657_v37  ;;  %v1813_v42 = vshrl.u32 %v2498_v0, %v1801_v38  ;;  %v1667_v40 = vsel %vm3647_vm0, 0, %v1665_v55  ;;  %v1537_v1 = vshll.u32 %v1536_v41, 30 }
 0x1d3   : > { %v1799_v21 = vshrl.u32 %v1798_v50, 5  ;;  %v1809_v11 = vshll.u32 %v2496_v56, %v1800_v16  ;;  %v1805_v63 = vor.u32 %v1804_v62, %v1803_v32  ;;  %v1808_v59 = vor.u32 %v1807_v12, %v1806_v2 }
 0x1d4   : > { %v1661_v31 = vmul.f32 %v1660_v58, %v1658_v10  ;;  %v1814_v18 = vor.u32 %v1813_v42, %v1812_v27  ;;  %v3681_v46 = vsub.s32 %v1534_v4, %v1537_v1  ;;  %v1815_v7 = vshll.u32 %v2498_v0, %v1800_v16 }
 0x1d5   : > { %v1811_v19 = vor.u32 %v1810_v57, %v1809_v11  ;;  %v1816_v35 = vshrl.u32 %v2499_v13, %v1801_v38  ;;  %v1671_v23 = vadd.s32 3, %v1667_v40  ;;  %v1834_v24 = vshll.u32 %v1794_v3, 8 }
 0x1d6   : > { %v1662_v39 = vxor.u32 2147483648, %v1661_v31  ;;  %v1685_v48 = vand.u32 2139095040, %v3663_v28  ;;  %v1540_v50 = vsub.s32 0, %v3681_v46  ;;  %vm1818_vm2 = vcmp.lt.s32.totalorder %v1799_v21, 1 }
 0x1d7   : > { %v1817_v33 = vor.u32 %v1816_v35, %v1815_v7  ;;  %vm1821_vm3 = vcmp.lt.s32.totalorder %v1799_v21, 4  ;;  %v1802_v8 = vshrl.u32 %v2494_v44, %v1801_v38  ;;  %vm1820_vm4 = vcmp.lt.s32.totalorder %v1799_v21, 3 }
 0x1d8   : > { %v1663_v22 = vsel %vm1580_vm9, %v1662_v39, %v1661_v31  ;;  %v1827_v61 = vsel %vm1821_vm3, %v1814_v18, 920167782  ;;  %v2223_v9 = vmin.u32 %v1540_v50, %v3681_v46  ;;  %v1823_v36 = vsel %vm1821_vm3, %v1811_v19, 2102212464 }
 0x1d9   : > { %v1666_v15 = vsel %vm3647_vm0, %v3421_v30, %v1663_v22  ;;  %v1826_v29 = vsel %vm1818_vm2, %v1805_v63, %v1808_v59  ;;  %v1828_v43 = vsel %vm1820_vm4, %v1811_v19, %v1827_v61  ;;  %v1830_v4 = vsel %vm1818_vm2, %v1808_v59, %v1811_v19 }
 0x1da   : > { %2405 = vcosq.f32 %v1666_v15  ;;  %v1831_v16 = vsel %vm1821_vm3, %v1817_v33, 1326507024  ;;  %v1542_v25 = vclz %v2223_v9  ;;  %v1560_v51 = vsub.s32 4, %v1536_v41 }
 0x1db   : > { %2407 = vsinq.f32 %v1666_v15  ;;  %vm1819_vm5 = vcmp.lt.s32.totalorder %v1799_v21, 2  ;;  %v1822_v47 = vsel %vm1818_vm2, %v1802_v8, %v1805_v63  ;;  %v1824_v52 = vsel %vm1820_vm4, %v1808_v59, %v1823_v36  ;;  %v416_v15 = vpop.permute.xlu1 %415 }
 0x1dc   : > { %v1829_v14 = vsel %vm1819_vm5, %v1826_v29, %v1828_v43  ;;  %v1832_v55 = vsel %vm1820_vm4, %v1814_v18, %v1831_v16  ;;  %v2224_v20 = vadd.s32 4294967294, %v1542_v25  ;;  %vm1476_vm6 = vcmp.lt.s32.totalorder %v3505_v17, 0 }
 0x1dd   : > { %v1833_v38 = vsel %vm1819_vm5, %v1830_v4, %v1832_v55  ;;  %v3700_v37 = vmul.u32.u64.low %v1834_v24, %v1829_v14  ;;  %v3701_v58 = vmul.u32.u64.high %v1834_v24, %v1829_v14, %v3700_v37  ;;  %v1686_v62 = vshrl.u32 %v1685_v48, 23 }
 0x1de   : > { %v3705_v3 = vmul.u32.u64.low %v1834_v24, %v1833_v38  ;;  %v3706_v32 = vmul.u32.u64.high %v1834_v24, %v1833_v38, %v3705_v3  ;;  %vm2225_vm7 = vcmp.lt.s32.totalorder %v2224_v20, 0  ;;  %v1561_v2 = vsel %vm1476_vm6, %v1560_v51, %v1536_v41 }
 0x1df   : > { %v1825_v12 = vsel %vm1819_vm5, %v1822_v47, %v1824_v52  ;;  %v1672_v10 = vand.u32 3, %v1671_v23  ;;  %vm3712_vm8 = vcmp.le.f32.partialorder %v1474_v45, 0.7853982  ;;  %v1545_v27 = vsel %vm2225_vm7, 0, %v2224_v20 }
 0x1e0   : > { %v2230_v42 = vadd.s32 4294967169, %v1686_v62  ;;  %v1530_v40 = vadd.s32 %v3625_v49, %v3636_v34  ;;  %v1546_v1 = vsub.s32 32, %v1545_v27  ;;  %v1550_v21 = vsub.s32 4294967266, %v1545_v27 }
 0x1e1   : > { %v1844_v11 = vadd.s32 1, %v3701_v58  ;;  %v1563_v41 = vsel %vm3712_vm8, 0, %v1561_v2  ;;  %v1841_v31 = vmul.u32 %v1834_v24, %v1825_v12  ;;  %vm1843_vm11 = vc.u32 %v3706_v32, %v3700_v37 }
 0x1e2   : > { %v1692_v45 = vadd.s32 1, %v2230_v42  ;;  %v1547_v63 = vshll.u32 %v3681_v46, %v1545_v27  ;;  %v1548_v59 = vshrl.u32 %v1530_v40, %v1546_v1  ;;  %v1551_v18 = vadd.s32 127, %v1550_v21 }
 0x1e3   : > { %v1845_v19 = vsel %vm1843_vm11, %v1844_v11, %v3701_v58  ;;  %vm1677_vm9 = vcmp.eq.s32.totalorder %v1672_v10, 2  ;;  %v1682_v34 = vand.u32 2147483647, %v3663_v28  ;;  %v1567_v33 = vadd.s32 3, %v1563_v41 }
 0x1e4   : > { %v2406_v7 = vpop.eup %2405  ;;  %v1846_v49 = vadd.s32 %v1845_v19, %v1841_v31  ;;  %vm1693_vm12 = vcmp.gt.s32.totalorder %v1692_v45, 0  ;;  %v1549_v23 = vor.u32 %v1548_v59, %v1547_v63  ;;  %v1552_v24 = vshll.u32 %v1551_v18, 23 }
 0x1e5   : > { %v2408_v35 = vpop.eup %2407  ;;  %v1678_v39 = vxor.u32 2147483648, %v2406_v7  ;;  %v1694_v48 = vsel %vm1693_vm12, %v1692_v45, 0  ;;  %vm1670_vm13 = vweird.f32 %v3421_v30  ;;  %vm1674_vm10 = vcmp.eq.s32.totalorder %v1672_v10, 0 }
 0x1e6   : > { %v1675_v50 = vxor.u32 2147483648, %v2408_v35  ;;  %v1847_v22 = vadd.s32 536870912, %v1846_v49  ;;  %v1696_v8 = vand.u32 31, %v1694_v48  ;;  %v1553_v61 = vor.u32 4788187, %v1552_v24 }
 0x1e7   : > { %v1679_v46 = vsel %vm1677_vm9, %v1678_v39, %v2408_v35  ;;  %vm1673_vm14 = vcmp.lt.s32.totalorder %v1672_v10, 2  ;;  %v1556_v16 = vcvt.s32.f32 %v1549_v23  ;;  %v1689_v25 = vand.u32 8388607, %v1682_v34 }
 0x1e8   : > { %v1676_v9 = vsel %vm1674_vm10, %v2406_v7, %v1675_v50  ;;  %v3727_v36 = vshrl.u32 %v1847_v22, 30  ;;  %v1697_v29 = vsub.s32 32, %v1696_v8  ;;  %v1554_v4 = vand.u32 2147483647, %v1553_v61 }
 0x1e9   : > { %v1680_v43 = vsel %vm1673_vm14, %v1676_v9, %v1679_v46  ;;  %v3731_v47 = vand.u32 3, %v1567_v33  ;;  %v3735_v52 = vadd.f32 %v416_v15, %v2687_v5  ;;  %v1699_v3 = vshll.u32 %v2494_v44, %v1696_v8 }
 0x1ea   : > { %v1681_v51 = vsel %vm1670_vm13, nan, %v1680_v43  ;;  %v1849_v30 = vshll.u32 %v3727_v36, 30  ;;  %v1557_v14 = vmul.f32 %v1556_v16, %v1554_v4  ;;  %v1700_v55 = vshrl.u32 %v2495_v54, %v1697_v29 }
 0x1eb   : > { %2109 = vst [vmem:[%s2979_s30 + $0x58] sm:$0xff] %v1681_v51  ;;  %v1703_v20 = vshrl.u32 %v2496_v56, %v1697_v29  ;;  %v1706_v38 = vshrl.u32 %v2497_v60, %v1697_v29  ;;  %v1702_v62 = vshll.u32 %v2495_v54, %v1696_v8  ;;  %v1709_v2 = vshrl.u32 %v2498_v0, %v1697_v29 }
 0x1ec   : > { %v3741_v58 = vsub.s32 %v1846_v49, %v1849_v30  ;;  %v1558_v12 = vxor.u32 2147483648, %v1557_v14  ;;  %v1690_v10 = vor.u32 8388608, %v1689_v25  ;;  %v1695_v5 = vshrl.u32 %v1694_v48, 5 }
 0x1ed   : > { %v1705_v27 = vshll.u32 %v2496_v56, %v1696_v8  ;;  %v1701_v40 = vor.u32 %v1700_v55, %v1699_v3  ;;  %v1704_v1 = vor.u32 %v1703_v20, %v1702_v62  ;;  %v1708_v21 = vshll.u32 %v2497_v60, %v1696_v8 }
 0x1ee   : > { %v1852_v42 = vsub.s32 0, %v3741_v58  ;;  %v1559_v11 = vsel %vm1476_vm6, %v1558_v12, %v1557_v14  ;;  %vm1788_vm0 = vcmp.lt.s32.totalorder %v3584_v26, 0  ;;  %v1711_v31 = vshll.u32 %v2498_v0, %v1696_v8  ;;  %v411_v12 = vpop.permute.xlu0 %410 }
 0x1ef   : > { %v1707_v41 = vor.u32 %v1706_v38, %v1705_v27  ;;  %v1712_v45 = vshrl.u32 %v2499_v13, %v1697_v29  ;;  %v1562_v63 = vsel %vm3712_vm8, %v3505_v17, %v1559_v11  ;;  %v1842_v59 = vadd.s32 %v3700_v37, %v3706_v32 }
 0x1f0   : > { %v2235_v18 = vmin.u32 %v1852_v42, %v3741_v58  ;;  %v1710_v19 = vor.u32 %v1709_v2, %v1708_v21  ;;  %2409 = vcosq.f32 %v1562_v63  ;;  %v1872_v7 = vsub.s32 4, %v3727_v36 }
 0x1f1   : > { %v1713_v49 = vor.u32 %v1712_v45, %v1711_v31  ;;  %v1730_v35 = vshll.u32 %v1690_v10, 8  ;;  %2411 = vsinq.f32 %v1562_v63  ;;  %vm3763_vm15 = vcmp.le.f32.partialorder %v1786_v53, 0.7853982 }
 0x1f2   : > { %v1854_v57 = vclz %v2235_v18  ;;  %vm1714_vm1 = vcmp.lt.s32.totalorder %v1695_v5, 1  ;;  %vm1717_vm2 = vcmp.lt.s32.totalorder %v1695_v5, 4  ;;  %v1698_v37 = vshrl.u32 %v2494_v44, %v1697_v29 }
 0x1f3   : > { %vm1715_vm3 = vcmp.lt.s32.totalorder %v1695_v5, 2  ;;  %v1719_v32 = vsel %vm1717_vm2, %v1707_v41, 2102212464  ;;  %v1722_v23 = vsel %vm1714_vm1, %v1701_v40, %v1704_v1  ;;  %vm1716_vm4 = vcmp.lt.s32.totalorder %v1695_v5, 3 }
 0x1f4   : > { %v2236_v24 = vadd.s32 4294967294, %v1854_v57  ;;  %v1723_v48 = vsel %vm1717_vm2, %v1710_v19, 920167782  ;;  %v1726_v50 = vsel %vm1714_vm1, %v1704_v1, %v1707_v41  ;;  %v1718_v33 = vsel %vm1714_vm1, %v1698_v37, %v1701_v40 }
 0x1f5   : > { %v1724_v22 = vsel %vm1716_vm4, %v1707_v41, %v1723_v48  ;;  %v1727_v8 = vsel %vm1717_vm2, %v1713_v49, 1326507024  ;;  %v1997_v53 = vand.u32 2139095040, %v3735_v52  ;;  %v1720_v46 = vsel %vm1716_vm4, %v1704_v1, %v1719_v32 }
 0x1f6   : > { %vm2237_vm5 = vcmp.lt.s32.totalorder %v2236_v24, 0  ;;  %v1725_v61 = vsel %vm1715_vm3, %v1722_v23, %v1724_v22  ;;  %v1728_v15 = vsel %vm1716_vm4, %v1710_v19, %v1727_v8  ;;  %vm1569_vm6 = vcmp.lt.s32.totalorder %v3731_v47, 2 }
 0x1f7   : > { %v1857_v9 = vsel %vm2237_vm5, 0, %v2236_v24  ;;  %v1729_v29 = vsel %vm1715_vm3, %v1726_v50, %v1728_v15  ;;  %v3772_v43 = vmul.u32.u64.low %v1730_v35, %v1725_v61  ;;  %v3773_v4 = vmul.u32.u64.high %v1730_v35, %v1725_v61, %v3772_v43 }
 0x1f8   : > { %vm1566_vm7 = vweird.f32 %v3505_v17  ;;  %v1858_v16 = vsub.s32 32, %v1857_v9  ;;  %v1862_v25 = vsub.s32 4294967266, %v1857_v9  ;;  %v1873_v51 = vsel %vm1788_vm0, %v1872_v7, %v3727_v36 }
 0x1f9   : > { %v1998_v30 = vshrl.u32 %v1997_v53, 23  ;;  %vm1570_vm8 = vcmp.eq.s32.totalorder %v3731_v47, 0  ;;  %v1721_v14 = vsel %vm1715_vm3, %v1718_v33, %v1720_v46  ;;  %v1859_v38 = vshll.u32 %v3741_v58, %v1857_v9 }
 0x1fa   : > { %v3782_v55 = vmul.u32.u64.low %v1730_v35, %v1729_v29  ;;  %v3783_v20 = vmul.u32.u64.high %v1730_v35, %v1729_v29, %v3782_v55  ;;  %v1860_v3 = vshrl.u32 %v1842_v59, %v1858_v16  ;;  %v1863_v62 = vadd.s32 127, %v1862_v25  ;;  %v2410_v10 = vpop.eup %2409 }
 0x1fb   : > { %v2242_v2 = vadd.s32 4294967169, %v1998_v30  ;;  %vm1573_vm11 = vcmp.eq.s32.totalorder %v3731_v47, 2  ;;  %v1875_v36 = vsel %vm3763_vm15, 0, %v1873_v51  ;;  %v1740_v27 = vadd.s32 1, %v3773_v4  ;;  %v2412_v42 = vpop.eup %2411 }
 0x1fc   : > { %v1994_v5 = vand.u32 2147483647, %v3735_v52  ;;  %v1574_v40 = vxor.u32 2147483648, %v2410_v10  ;;  %v1861_v1 = vor.u32 %v1860_v3, %v1859_v38  ;;  %v1864_v21 = vshll.u32 %v1863_v62, 23 }
 0x1fd   : > { %v2004_v11 = vadd.s32 1, %v2242_v2  ;;  %v1571_v58 = vxor.u32 2147483648, %v2412_v42  ;;  %v1737_v41 = vmul.u32 %v1730_v35, %v1721_v14  ;;  %vm1739_vm9 = vc.u32 %v3783_v20, %v3772_v43 }
 0x1fe   : > { %v3794_v31 = vadd.f32 %v411_v12, %v2689_v6  ;;  %v1575_v45 = vsel %vm1573_vm11, %v1574_v40, %v2412_v42  ;;  %v1865_v63 = vor.u32 4788187, %v1864_v21  ;;  %v1879_v59 = vadd.s32 3, %v1875_v36 }
 0x1ff   : > { %v1741_v18 = vsel %vm1739_vm9, %v1740_v27, %v3773_v4  ;;  %v1572_v19 = vsel %vm1570_vm8, %v2410_v10, %v1571_v58  ;;  %v2001_v49 = vand.u32 8388607, %v1994_v5  ;;  %vm2005_vm12 = vcmp.gt.s32.totalorder %v2004_v11, 0 }
 0x200   : > { %v1742_v7 = vadd.s32 %v1741_v18, %v1737_v41  ;;  %v1576_v35 = vsel %vm1569_vm6, %v1572_v19, %v1575_v45  ;;  %v1866_v57 = vand.u32 2147483647, %v1865_v63  ;;  %v1868_v6 = vcvt.s32.f32 %v1861_v1 }
 0x201   : > { %v2006_v37 = vsel %vm2005_vm12, %v2004_v11, 0  ;;  %v1577_v32 = vsel %vm1566_vm7, nan, %v1576_v35  ;;  %v3806_v50 = vand.u32 3, %v1879_v59  ;;  %v2002_v53 = vor.u32 8388608, %v2001_v49 }
 0x202   : > { %v1743_v23 = vadd.s32 536870912, %v1742_v7  ;;  %v2008_v24 = vand.u32 31, %v2006_v37  ;;  %2108 = vst [vmem:[%s2979_s30 + $0x50] sm:$0xff] %v1577_v32  ;;  %v1869_v48 = vmul.f32 %v1868_v6, %v1866_v57  ;;  %v3810_v46 = vshrl.u32 %v2006_v37, 5 }
 0x203   : > { %v1893_v47 = vand.u32 2139095040, %v3794_v31  ;;  %v2042_v42 = vshll.u32 %v2002_v53, 8  ;;  %vm1882_vm14 = vcmp.eq.s32.totalorder %v3806_v50, 0  ;;  %vm1878_vm2 = vweird.f32 %v3584_v26 }
 0x204   : > { %v3808_v33 = vshrl.u32 %v1743_v23, 30  ;;  %v2009_v22 = vsub.s32 32, %v2008_v24  ;;  %v1870_v8 = vxor.u32 2147483648, %v1869_v48  ;;  %v2011_v17 = vshll.u32 %v2494_v44, %v2008_v24 }
 0x205   : > { %v2014_v9 = vshll.u32 %v2495_v54, %v2008_v24  ;;  %v2017_v14 = vshll.u32 %v2496_v56, %v2008_v24  ;;  %v2020_v55 = vshll.u32 %v2497_v60, %v2008_v24  ;;  %v1894_v62 = vshrl.u32 %v1893_v47, 23 }
 0x206   : > { %v1745_v61 = vshll.u32 %v3808_v33, 30  ;;  %v2012_v15 = vshrl.u32 %v2495_v54, %v2009_v22  ;;  %v1871_v29 = vsel %vm1788_vm0, %v1870_v8, %v1869_v48  ;;  %v2015_v4 = vshrl.u32 %v2496_v56, %v2009_v22 }
 0x207   : > { %v2018_v16 = vshrl.u32 %v2497_v60, %v2009_v22  ;;  %v2021_v25 = vshrl.u32 %v2498_v0, %v2009_v22  ;;  %v1874_v51 = vsel %vm3763_vm15, %v3584_v26, %v1871_v29  ;;  %v2023_v36 = vshll.u32 %v2498_v0, %v2008_v24 }
 0x208   : > { %v3825_v30 = vsub.s32 %v1742_v7, %v1745_v61  ;;  %2413 = vcosq.f32 %v1874_v51  ;;  %v2013_v38 = vor.u32 %v2012_v15, %v2011_v17  ;;  %v2016_v3 = vor.u32 %v2015_v4, %v2014_v9 }
 0x209   : > { %2415 = vsinq.f32 %v1874_v51  ;;  %v2019_v12 = vor.u32 %v2018_v16, %v2017_v14  ;;  %v2022_v10 = vor.u32 %v2021_v25, %v2020_v55  ;;  %v2024_v39 = vshrl.u32 %v2499_v13, %v2009_v22 }
 0x20a   : > { %v1748_v2 = vsub.s32 0, %v3825_v30  ;;  %vm2026_vm13 = vcmp.lt.s32.totalorder %v3810_v46, 1  ;;  %vm2029_vm10 = vcmp.lt.s32.totalorder %v3810_v46, 4  ;;  %v2238_v11 = vadd.s32 4294967169, %v1894_v62 }
 0x20b   : > { %v2025_v40 = vor.u32 %v2024_v39, %v2023_v36  ;;  %v2034_v1 = vsel %vm2026_vm13, %v2013_v38, %v2016_v3  ;;  %v2035_v21 = vsel %vm2029_vm10, %v2022_v10, 920167782  ;;  %v2010_v41 = vshrl.u32 %v2494_v44, %v2009_v22 }
 0x20c   : > { %v2231_v27 = vmin.u32 %v1748_v2, %v3825_v30  ;;  %vm2028_vm0 = vcmp.lt.s32.totalorder %v3810_v46, 3  ;;  %v2031_v45 = vsel %vm2029_vm10, %v2019_v12, 2102212464  ;;  %vm1881_vm15 = vcmp.lt.s32.totalorder %v3806_v50, 2 }
 0x20d   : > { %vm2027_vm1 = vcmp.lt.s32.totalorder %v3810_v46, 2  ;;  %v2036_v63 = vsel %vm2028_vm0, %v2019_v12, %v2035_v21  ;;  %v2038_v59 = vsel %vm2026_vm13, %v2016_v3, %v2019_v12  ;;  %v2039_v18 = vsel %vm2029_vm10, %v2025_v40, 1326507024 }
 0x20e   : > { %v1750_v58 = vclz %v2231_v27  ;;  %v2030_v7 = vsel %vm2026_vm13, %v2010_v41, %v2013_v38  ;;  %v2037_v49 = vsel %vm2027_vm1, %v2034_v1, %v2036_v63  ;;  %v2040_v35 = vsel %vm2028_vm0, %v2022_v10, %v2039_v18 }
 0x20f   : > { %v2032_v57 = vsel %vm2028_vm0, %v2016_v3, %v2031_v45  ;;  %v2041_v6 = vsel %vm2027_vm1, %v2038_v59, %v2040_v35  ;;  %v3851_v37 = vmul.u32.u64.low %v2042_v42, %v2037_v49  ;;  %v3852_v32 = vmul.u32.u64.high %v2042_v42, %v2037_v49, %v3851_v37 }
 0x210   : > { %v2232_v19 = vadd.s32 4294967294, %v1750_v58  ;;  %vm1885_vm3 = vcmp.eq.s32.totalorder %v3806_v50, 2  ;;  %v3856_v23 = vmul.u32.u64.low %v2042_v42, %v2041_v6  ;;  %v3857_v24 = vmul.u32.u64.high %v2042_v42, %v2041_v6, %v3856_v23 }
 0x211   : > { %v1738_v22 = vadd.s32 %v3772_v43, %v3783_v20  ;;  %v1890_v53 = vand.u32 2147483647, %v3794_v31  ;;  %v1900_v47 = vadd.s32 1, %v2238_v11  ;;  %v2033_v29 = vsel %vm2027_vm1, %v2030_v7, %v2032_v57 }
 0x212   : > { %vm2233_vm4 = vcmp.lt.s32.totalorder %v2232_v19, 0  ;;  %v2414_v48 = vpop.eup %2413  ;;  %v1768_v16 = vsub.s32 4, %v3808_v33  ;;  %v2052_v25 = vadd.s32 1, %v3852_v32  ;;  %v2049_v38 = vmul.u32 %v2042_v42, %v2033_v29 }
 0x213   : > { %v1753_v8 = vsel %vm2233_vm4, 0, %v2232_v19  ;;  %v2416_v61 = vpop.eup %2415  ;;  %v1886_v17 = vxor.u32 2147483648, %v2414_v48  ;;  %vm1901_vm5 = vcmp.gt.s32.totalorder %v1900_v47, 0  ;;  %vm2051_vm6 = vc.u32 %v3857_v24, %v3851_v37 }
 0x214   : > { %v1754_v15 = vsub.s32 32, %v1753_v8  ;;  %v1758_v9 = vsub.s32 4294967266, %v1753_v8  ;;  %v1883_v4 = vxor.u32 2147483648, %v2416_v61  ;;  %v1755_v20 = vshll.u32 %v3825_v30, %v1753_v8 }
 0x215   : > { %v1887_v43 = vsel %vm1885_vm3, %v1886_v17, %v2416_v61  ;;  %v1902_v46 = vsel %vm1901_vm5, %v1900_v47, 0  ;;  %v2053_v12 = vsel %vm2051_vm6, %v2052_v25, %v3852_v32  ;;  %vm1684_vm7 = vcmp.lt.s32.totalorder %v3663_v28, 0 }
 0x216   : > { %v1756_v51 = vshrl.u32 %v1738_v22, %v1754_v15  ;;  %v1759_v14 = vadd.s32 127, %v1758_v9  ;;  %v1884_v55 = vsel %vm1882_vm14, %v2414_v48, %v1883_v4  ;;  %v2054_v10 = vadd.s32 %v2053_v12, %v2049_v38 }
 0x217   : > { %v1888_v3 = vsel %vm1881_vm15, %v1884_v55, %v1887_v43  ;;  %v1904_v36 = vand.u32 31, %v1902_v46  ;;  %v1897_v42 = vand.u32 8388607, %v1890_v53  ;;  %v1769_v21 = vsel %vm1684_vm7, %v1768_v16, %v3808_v33 }
 0x218   : > { %v1757_v62 = vor.u32 %v1756_v51, %v1755_v20  ;;  %v1760_v2 = vshll.u32 %v1759_v14, 23  ;;  %v1889_v30 = vsel %vm1878_vm2, nan, %v1888_v3  ;;  %v2055_v27 = vadd.s32 536870912, %v2054_v10 }
 0x219   : > { %2111 = vst [vmem:[%s2979_s30 + $0x68] sm:$0xff] %v1889_v30  ;;  %v1905_v40 = vsub.s32 32, %v1904_v36  ;;  %v1903_v11 = vshrl.u32 %v1902_v46, 5  ;;  %v1916_v45 = vshll.u32 %v2497_v60, %v1904_v36  ;;  %v1907_v33 = vshll.u32 %v2494_v44, %v1904_v36 }
 0x21a   : > { %v1761_v39 = vor.u32 4788187, %v1760_v2  ;;  %v1764_v1 = vcvt.s32.f32 %v1757_v62  ;;  %v3885_v26 = vshrl.u32 %v2055_v27, 30  ;;  %v1910_v49 = vshll.u32 %v2495_v54, %v1904_v36 }
 0x21b   : > { %v1908_v58 = vshrl.u32 %v2495_v54, %v1905_v40  ;;  %v1911_v41 = vshrl.u32 %v2496_v56, %v1905_v40  ;;  %v1914_v59 = vshrl.u32 %v2497_v60, %v1905_v40  ;;  %v1917_v18 = vshrl.u32 %v2498_v0, %v1905_v40 }
 0x21c   : > { %v1762_v50 = vand.u32 2147483647, %v1761_v39  ;;  %v1920_v19 = vshrl.u32 %v2499_v13, %v1905_v40  ;;  %v2057_v7 = vshll.u32 %v3885_v26, 30  ;;  %v1913_v35 = vshll.u32 %v2496_v56, %v1904_v36 }
 0x21d   : > { %vm3899_vm8 = vcmp.le.f32.partialorder %v1682_v34, 0.7853982  ;;  %v1918_v60 = vor.u32 %v1917_v18, %v1916_v45  ;;  %v1919_v32 = vshll.u32 %v2498_v0, %v1904_v36  ;;  %v1909_v13 = vor.u32 %v1908_v58, %v1907_v33 }
 0x21e   : > { %v1765_v63 = vmul.f32 %v1764_v1, %v1762_v50  ;;  %v2058_v23 = vsub.s32 %v2054_v10, %v2057_v7  ;;  %v1912_v48 = vor.u32 %v1911_v41, %v1910_v49  ;;  %v1915_v22 = vor.u32 %v1914_v59, %v1913_v35 }
 0x21f   : > { %v1771_v54 = vsel %vm3899_vm8, 0, %v1769_v21  ;;  %v1921_v56 = vor.u32 %v1920_v19, %v1919_v32  ;;  %v1898_v61 = vor.u32 8388608, %v1897_v42  ;;  %vm1925_vm11 = vcmp.lt.s32.totalorder %v1903_v11, 4 }
 0x220   : > { %v1766_v6 = vxor.u32 2147483648, %v1765_v63  ;;  %v2060_v47 = vsub.s32 0, %v2058_v23  ;;  %vm1922_vm9 = vcmp.lt.s32.totalorder %v1903_v11, 1  ;;  %vm1924_vm12 = vcmp.lt.s32.totalorder %v1903_v11, 3 }
 0x221   : > { %v1931_v0 = vsel %vm1925_vm11, %v1918_v60, 920167782  ;;  %v1927_v15 = vsel %vm1925_vm11, %v1915_v22, 2102212464  ;;  %v1930_v9 = vsel %vm1922_vm9, %v1909_v13, %v1912_v48  ;;  %v1906_v29 = vshrl.u32 %v2494_v44, %v1905_v40 }
 0x222   : > { %v1767_v8 = vsel %vm1684_vm7, %v1766_v6, %v1765_v63  ;;  %v2243_v17 = vmin.u32 %v2060_v47, %v2058_v23  ;;  %v1932_v4 = vsel %vm1924_vm12, %v1915_v22, %v1931_v0  ;;  %v1934_v16 = vsel %vm1922_vm9, %v1912_v48, %v1915_v22 }
 0x223   : > { %v1770_v34 = vsel %vm3899_vm8, %v3663_v28, %v1767_v8  ;;  %v1935_v25 = vsel %vm1925_vm11, %v1921_v56, 1326507024  ;;  %v1775_v43 = vadd.s32 3, %v1771_v54  ;;  %vm1923_vm13 = vcmp.lt.s32.totalorder %v1903_v11, 2 }
 0x224   : > { %2417 = vcosq.f32 %v1770_v34  ;;  %v2062_v20 = vclz %v2243_v17  ;;  %v1938_v51 = vshll.u32 %v1898_v61, 8  ;;  %v1926_v14 = vsel %vm1922_vm9, %v1906_v29, %v1909_v13 }
 0x225   : > { %2419 = vsinq.f32 %v1770_v34  ;;  %v1928_v55 = vsel %vm1924_vm12, %v1912_v48, %v1927_v15  ;;  %v1933_v38 = vsel %vm1923_vm13, %v1930_v9, %v1932_v4  ;;  %v1936_v46 = vsel %vm1924_vm12, %v1918_v60, %v1935_v25 }
 0x226   : > { %v2244_v3 = vadd.s32 4294967294, %v2062_v20  ;;  %v1937_v62 = vsel %vm1923_vm13, %v1934_v16, %v1936_v46  ;;  %v3915_v2 = vmul.u32.u64.low %v1938_v51, %v1933_v38  ;;  %v3916_v12 = vmul.u32.u64.high %v1938_v51, %v1933_v38, %v3915_v2 }
 0x227   : > { %v3918_v44 = vmul.u32.u64.low %v1938_v51, %v1937_v62  ;;  %v3919_v30 = vmul.u32.u64.high %v1938_v51, %v1937_v62, %v3918_v44  ;;  %v1929_v10 = vsel %vm1923_vm13, %v1926_v14, %v1928_v55  ;;  %v1776_v36 = vand.u32 3, %v1775_v43 }
 0x228   : > { %vm2245_vm10 = vcmp.lt.s32.totalorder %v2244_v3, 0  ;;  %v2050_v27 = vadd.s32 %v3851_v37, %v3857_v24  ;;  %v1948_v50 = vadd.s32 1, %v3916_v12  ;;  %v1945_v11 = vmul.u32 %v1938_v51, %v1929_v10 }
 0x229   : > { %v2065_v39 = vsel %vm2245_vm10, 0, %v2244_v3  ;;  %vm1947_vm14 = vc.u32 %v3919_v30, %v3915_v2  ;;  %vm1781_vm0 = vcmp.eq.s32.totalorder %v1776_v36, 2  ;;  %vm1778_vm15 = vcmp.eq.s32.totalorder %v1776_v36, 0 }
 0x22a   : > { %v2066_v42 = vsub.s32 32, %v2065_v39  ;;  %v2070_v40 = vsub.s32 4294967266, %v2065_v39  ;;  %v2067_v21 = vshll.u32 %v2058_v23, %v2065_v39  ;;  %v1949_v59 = vsel %vm1947_vm14, %v1948_v50, %v3916_v12 }
 0x22b   : > { %v1950_v19 = vadd.s32 %v1949_v59, %v1945_v11  ;;  %vm1777_vm1 = vcmp.lt.s32.totalorder %v1776_v36, 2  ;;  %vm1774_vm2 = vweird.f32 %v3663_v28  ;;  %v2080_v22 = vsub.s32 4, %v3885_v26 }
 0x22c   : > { %v2068_v45 = vshrl.u32 %v2050_v27, %v2066_v42  ;;  %v2071_v63 = vadd.s32 127, %v2070_v40  ;;  %vm1996_vm3 = vcmp.lt.s32.totalorder %v3735_v52, 0  ;;  %vm1995_vm4 = vcmp.le.f32.partialorder %v1994_v5, 0.7853982 }
 0x22d   : > { %v1951_v49 = vadd.s32 536870912, %v1950_v19  ;;  %v2081_v34 = vsel %vm1996_vm3, %v2080_v22, %v3885_v26  ;;  %v1946_v4 = vadd.s32 %v3915_v2, %v3919_v30  ;;  %vm2086_vm11 = vweird.f32 %v3735_v52 }
 0x22e   : > { %v2418_v1 = vpop.eup %2417  ;;  %v2069_v24 = vor.u32 %v2068_v45, %v2067_v21  ;;  %v2072_v7 = vshll.u32 %v2071_v63, 23  ;;  %v2083_v0 = vsel %vm1995_vm4, 0, %v2081_v34  ;;  %vm1892_vm9 = vcmp.lt.s32.totalorder %v3794_v31, 0 }
 0x22f   : > { %v2420_v58 = vpop.eup %2419  ;;  %v1782_v41 = vxor.u32 2147483648, %v2418_v1  ;;  %v1952_v60 = vshrl.u32 %v1951_v49, 30  ;;  %v2087_v9 = vadd.s32 3, %v2083_v0  ;;  %vm1891_vm12 = vcmp.le.f32.partialorder %v1890_v53, 0.7853982 }
 0x230   : > { %v1779_v18 = vxor.u32 2147483648, %v2420_v58  ;;  %v2073_v57 = vor.u32 4788187, %v2072_v7  ;;  %v2076_v23 = vcvt.s32.f32 %v2069_v24 }
 0x231   : > { %v1783_v37 = vsel %vm1781_vm0, %v1782_v41, %v2420_v58  ;;  %v1953_v13 = vshll.u32 %v1952_v60, 30  ;;  %v2088_v43 = vand.u32 3, %v2087_v9  ;;  %v1976_v27 = vsub.s32 4, %v1952_v60 }
 0x232   : > { %v1780_v33 = vsel %vm1778_vm15, %v2418_v1, %v1779_v18  ;;  %v2074_v32 = vand.u32 2147483647, %v2073_v57  ;;  %vm1982_vm0 = vweird.f32 %v3794_v31 }
 0x233   : > { %v1784_v35 = vsel %vm1777_vm1, %v1780_v33, %v1783_v37  ;;  %v1954_v8 = vsub.s32 %v1950_v19, %v1953_v13  ;;  %vm2093_vm6 = vcmp.eq.s32.totalorder %v2088_v43, 2  ;;  %vm2090_vm7 = vcmp.eq.s32.totalorder %v2088_v43, 0 }
 0x234   : > { %v1785_v6 = vsel %vm1774_vm2, nan, %v1784_v35  ;;  %v2077_v48 = vmul.f32 %v2076_v23, %v2074_v32  ;;  %vm2089_vm8 = vcmp.lt.s32.totalorder %v2088_v43, 2  ;;  %v1977_v50 = vsel %vm1892_vm9, %v1976_v27, %v1952_v60 }
 0x235   : > { %2110 = vst [vmem:[%s2979_s30 + $0x60] sm:$0xff] %v1785_v6  ;;  %v1956_v56 = vsub.s32 0, %v1954_v8 }
 0x236   : > { %v2078_v54 = vxor.u32 2147483648, %v2077_v48 }
 0x237   : > { %v2239_v61 = vmin.u32 %v1956_v56, %v1954_v8 }
 0x238   : > { %v2079_v28 = vsel %vm1996_vm3, %v2078_v54, %v2077_v48 }
 0x239   : > { %v2082_v47 = vsel %vm1995_vm4, %v3735_v52, %v2079_v28  ;;  %v1958_v17 = vclz %v2239_v61  ;;  %v1979_v52 = vsel %vm1891_vm12, 0, %v1977_v50 }
 0x23a   : > { %2421 = vcosq.f32 %v2082_v47  ;;  %v1983_v21 = vadd.s32 3, %v1979_v52 }
 0x23b   : > { %2423 = vsinq.f32 %v2082_v47  ;;  %v2240_v15 = vadd.s32 4294967294, %v1958_v17 }
 0x23c   : > { %v1984_v11 = vand.u32 3, %v1983_v21 }
 0x23d   : > { %vm2241_vm5 = vcmp.lt.s32.totalorder %v2240_v15, 0 }
 0x23e   : > { %v1961_v29 = vsel %vm2241_vm5, 0, %v2240_v15  ;;  %vm1989_vm13 = vcmp.eq.s32.totalorder %v1984_v11, 2  ;;  %vm1986_vm10 = vcmp.eq.s32.totalorder %v1984_v11, 0  ;;  %vm1985_vm14 = vcmp.lt.s32.totalorder %v1984_v11, 2 }
 0x23f   : > { %v1962_v16 = vsub.s32 32, %v1961_v29  ;;  %v1966_v25 = vsub.s32 4294967266, %v1961_v29  ;;  %v1963_v5 = vshll.u32 %v1954_v8, %v1961_v29 }
 0x241   : > { %v1964_v20 = vshrl.u32 %v1946_v4, %v1962_v16  ;;  %v1967_v51 = vadd.s32 127, %v1966_v25 }
 0x243   : > { %v1965_v38 = vor.u32 %v1964_v20, %v1963_v5  ;;  %v1968_v46 = vshll.u32 %v1967_v51, 23 }
 0x244   : > { %v2422_v26 = vpop.eup %2421 }
 0x245   : > { %v2424_v14 = vpop.eup %2423  ;;  %v2094_v55 = vxor.u32 2147483648, %v2422_v26  ;;  %v1969_v12 = vor.u32 4788187, %v1968_v46  ;;  %v1972_v10 = vcvt.s32.f32 %v1965_v38 }
 0x246   : > { %v2091_v3 = vxor.u32 2147483648, %v2424_v14 }
 0x247   : > { %v2095_v62 = vsel %vm2093_vm6, %v2094_v55, %v2424_v14  ;;  %v1970_v30 = vand.u32 2147483647, %v1969_v12 }
 0x248   : > { %v2092_v44 = vsel %vm2090_vm7, %v2422_v26, %v2091_v3 }
 0x249   : > { %v2096_v2 = vsel %vm2089_vm8, %v2092_v44, %v2095_v62  ;;  %v1973_v39 = vmul.f32 %v1972_v10, %v1970_v30 }
 0x24a   : > { %v2097_v36 = vsel %vm2086_vm11, nan, %v2096_v2 }
 0x24b   : > { %2113 = vst [vmem:[%s2979_s30 + $0x78] sm:$0xff] %v2097_v36  ;;  %v1974_v42 = vxor.u32 2147483648, %v1973_v39 }
 0x24d   : > { %v1975_v40 = vsel %vm1892_vm9, %v1974_v42, %v1973_v39 }
 0x24e   : > { %v1978_v1 = vsel %vm1891_vm12, %v3794_v31, %v1975_v40 }
 0x24f   : > { %2425 = vcosq.f32 %v1978_v1 }
 0x250   : > { %2427 = vsinq.f32 %v1978_v1 }
 0x259   : > { %v2426_v58 = vpop.eup %2425 }
 0x25a   : > { %v2428_v41 = vpop.eup %2427  ;;  %v1990_v45 = vxor.u32 2147483648, %v2426_v58 }
 0x25b   : > { %v1987_v63 = vxor.u32 2147483648, %v2428_v41 }
 0x25c   : > { %v1991_v53 = vsel %vm1989_vm13, %v1990_v45, %v2428_v41 }
 0x25d   : > { %v1988_v59 = vsel %vm1986_vm10, %v2426_v58, %v1987_v63 }
 0x25e   : > { %v1992_v18 = vsel %vm1985_vm14, %v1988_v59, %v1991_v53 }
 0x25f   : > { %v1993_v19 = vsel %vm1982_vm0, nan, %v1992_v18 }
 0x260   : > { %2112 = vst [vmem:[%s2979_s30 + $0x70] sm:$0xff] %v1993_v19 }
 0x261   : > { %2442 = shalt.err (!%p2439_p2)
}
 0x262   : > { %s2443_s21 = scalar_lea.hbm %s3946_s6, 2048  ;;  %s2447_s24 = scalar_lea.hbm %s3997_s2, 4096 }
 0x263   : > { %p2444_p3 = scmp.ne.s32.totalorder %s3946_s6, %s2443_s21  ;;  %p2448_p8 = scmp.lt.u32.totalorder %s3946_s6, %s3997_s2 }
 0x264   : > { %p2449_p9 = scmp.lt.u32.totalorder %s2447_s24, %s2443_s21  ;;  %p2451_p11 = scmp.lt.u32.totalorder %s2443_s21, %s3946_s6 }
 0x265   : > { %p2445_p4 = pnand %p2444_p3, %p2556_p5 }
 0x266   : > { %p2450_p10 = por %p2449_p9, %p2448_p8 }
 0x267   : > { %p2446_p7 = pneg %p2445_p4 }
 0x268   : > { %p2452_p12 = por %p2451_p11, %p2450_p10 }
 0x26a   : > { %p2453_p13 = pnand %p2452_p12, %p2446_p7 }
 0x26c   : > { %2456 = shalt.err (!%p2453_p13)
}
 0x26d   : > { %s2501_s27 = smov 128   ;;  %s2502_s28 = smov 256  }
 0x26e   : > { %s2503_s13 = smov 8  }
 0x26f   : > { %2314 = dma.vmem_to_hbm [thread:$0]  (%p2556_p5), %s3948_s3, 2048, %s3946_s6, %s3954_s7, %s2501_s27, %s2502_s28, %s2503_s13  }
 0x270 PF: > { %p2320_p0 = scmp.ge.s32.totalorder %s2491_s12, 2  ;;  %s2142_s29 = sand.u32 1, %s2479_s9  }
 0x271   : > { %s2143_s30 = scalar_lea.sflag [#allocation3], %s2142_s29 }
 0x272   : > { %p2317_p1 = pnand %p2320_p0, %p2560_p6 }
 0x274   : > { %2474 = dma.done.wait (!%p2317_p1), %s2143_s30, 2048  }
 0x275   : > { %2476 = vsyncadd (!%p2317_p1), %s2143_s30, 4294965248  ;;  %p12_p2 = scmp.ge.s32.totalorder %s2542_s15, 4   ;;  %s4028_s9 = smov %s2483_s10 }
 0x276   : > { %s4029_s10 = smov %s2487_s11  ;;  %s4030_s11 = smov %s2554_s18 }
 0x277   : > { %s4031_s12 = smov %s2542_s15  ;;  %14 = sbr.rel (!%p12_p2) target bundleno = 3 (0x3), region = 60 }
 0x27e   :  { %2148 = vsyncpa [#allocation3], 1 }
 0x27f   :  { %2150 = vsyncpa [#allocation3 + $0x1], 1 }

</bundles_post_ra>
